<compile_context>
chip_gen: v7x
topology: tpu7x:2x2x1
jax: 0.10.0
libtpu: 0.0.40
codegen_flags: <defaults>
</compile_context>

<pallas_src>
import functools

import jax
import jax.numpy as jnp
from jax.experimental import pallas as pl
from jax.experimental.pallas import tpu as pltpu

NEG_SLOPE = 0.1
BN_EPS = 1e-5
LANE = 128


# ------------------------------ Pallas kernel -------------------------------

def _fused_block_kernel(mask_ref, x_ref,
                        w1_ref, s1_ref, b1_ref,
                        w2_ref, s2_ref, b2_ref,
                        w3_ref, s3_ref, b3_ref,
                        wsc_ref, ssc_ref, bsc_ref,
                        o_ref, h1_ref, h2_ref, *, H, W):
    """Whole BasicBlockRN12 forward for one image.

    mask  : (1, L)        f32  1.0 on valid (non-pad) columns of the flat rows
    x_ref : (1, Cin, L)   bf16 padded-flat input (zero ring, lane-padded to L)
    w*    : (9, Cout, C)  bf16 per-tap 3x3 weights (tap k = kh*3 + kw)
    s*/b* : (Cout, 1)     f32  folded eval-mode BatchNorm scale / bias
    wsc   : (Cout, Cin)   bf16 1x1 shortcut conv weights
    o_ref : (1, Cout, H*Wp) f32 (pad columns dropped by the wrapper slice)
    h1/h2 : (Cout, L)     bf16 VMEM scratch, padded-flat intermediates
    """
    Wp = W + 2
    HWp = H * Wp
    i0 = Wp + 1                                   # first interior lane

    mask = mask_ref[:, :HWp]                      # (1, HWp)

    def conv3x3(read, w_ref):
        # 9 shifted (Cout, C) @ (C, H*Wp) MXU matmuls, bf16 in / f32 acc.
        cout = w_ref.shape[1]
        acc = jnp.zeros((cout, HWp), jnp.float32)
        for k in range(9):                        # unrolled
            kh, kw = divmod(k, 3)
            acc = acc + jnp.dot(w_ref[k], read(kh * Wp + kw),
                                preferred_element_type=jnp.float32)
        return acc

    # Fresh zero pad-ring for this image's intermediates (single aligned
    # full-tile store each; keeps every grid step independent -> "parallel" safe).
    h1_ref[...] = jnp.zeros_like(h1_ref)
    h2_ref[...] = jnp.zeros_like(h2_ref)

    # ---- conv1 + bn1 + leaky_relu -> h1 (VMEM) ------------------------------
    y = conv3x3(lambda off: x_ref[0, :, off:off + HWp], w1_ref)
    y = y * s1_ref[...] + b1_ref[...]
    y = jnp.where(y > 0, y, NEG_SLOPE * y)
    h1_ref[:, i0:i0 + HWp] = (y * mask).astype(h1_ref.dtype)

    # ---- conv2 + bn2 + leaky_relu -> h2 (VMEM) ------------------------------
    y = conv3x3(lambda off: h1_ref[:, off:off + HWp], w2_ref)
    y = y * s2_ref[...] + b2_ref[...]
    y = jnp.where(y > 0, y, NEG_SLOPE * y)
    h2_ref[:, i0:i0 + HWp] = (y * mask).astype(h2_ref.dtype)

    # ---- conv3 + bn3 + (1x1 shortcut conv + bn) residual --------------------
    y = conv3x3(lambda off: h2_ref[:, off:off + HWp], w3_ref)
    y = y * s3_ref[...] + b3_ref[...]
    xc = x_ref[0, :, i0:i0 + HWp]                 # center tap == 1x1 conv input
    sc = jnp.dot(wsc_ref[...], xc, preferred_element_type=jnp.float32)
    y = y + sc * ssc_ref[...] + bsc_ref[...]
    # Garbage pad columns stay as-is; the wrapper's [..., :W] slice drops them.
    o_ref[0, :, :] = y.astype(o_ref.dtype)


# --------------------------------- wrapper -----------------------------------

def _fold_bn(gamma, beta, cout):
    # eval-mode BN folded with running_mean=0, running_var=1
    scale = (gamma / jnp.sqrt(1.0 + BN_EPS)).reshape(cout, 1).astype(jnp.float32)
    bias = beta.reshape(cout, 1).astype(jnp.float32)
    return scale, bias


def _taps(w_oihw):
    co, ci = w_oihw.shape[:2]
    return jnp.transpose(w_oihw, (2, 3, 0, 1)).reshape(9, co, ci).astype(jnp.bfloat16)


def basic_block_forward(params, x_nchw):
    """lrelu(bn1(conv1(x))) -> lrelu(bn2(conv2(.))) -> bn3(conv3(.)) + shortcut(x)."""
    N, Cin, H, W = x_nchw.shape
    Cout = params['w1'].shape[0]
    Hp, Wp = H + 2, W + 2
    HpWp, HWp = Hp * Wp, H * Wp
    # lane-aligned flat extent; >= HpWp + 2 so every shifted tap slice is in-bounds
    L = ((HpWp + 2 + LANE - 1) // LANE) * LANE

    # padded-flat bf16 input, lane-padded with zeros to L
    x_pf = jnp.pad(x_nchw, ((0, 0), (0, 0), (1, 1), (1, 1))).reshape(N, Cin, HpWp)
    x_pf = jnp.pad(x_pf, ((0, 0), (0, 0), (0, L - HpWp))).astype(jnp.bfloat16)

    # precomputed pad-column mask (no iota / modulo inside the kernel)
    col = jnp.arange(L, dtype=jnp.int32) % Wp
    mask = (col < W).astype(jnp.float32).reshape(1, L)

    w1, w2, w3 = _taps(params['w1']), _taps(params['w2']), _taps(params['w3'])
    wsc = params['wsc'].reshape(Cout, Cin).astype(jnp.bfloat16)
    s1, b1 = _fold_bn(params['bn1_g'], params['bn1_b'], Cout)
    s2, b2 = _fold_bn(params['bn2_g'], params['bn2_b'], Cout)
    s3, b3 = _fold_bn(params['bn3_g'], params['bn3_b'], Cout)
    ssc, bsc = _fold_bn(params['bnsc_g'], params['bnsc_b'], Cout)

    # explicit VMEM budget (v7x: 64 MiB physical / 32 MiB default scoped)
    bytes_needed = (
        2 * (Cin * L * 2 + Cout * HWp * 4 + L * 4)                  # dbl-buffered x / out / mask
        + 2 * 2 * (9 * Cout * (Cin + 2 * Cout) + Cout * Cin)        # weights, bf16, dbl-buffered
        + 2 * 8 * Cout * 4                                          # bn scale / bias
        + 2 * Cout * L * 2)                                         # h1 / h2 scratch
    vmem_limit = int(min(96 * 2**20, max(4 * 2**20, 4 * bytes_needed)))

    sb_spec = pl.BlockSpec((Cout, 1), lambda n: (0, 0))
    out_flat = pl.pallas_call(
        functools.partial(_fused_block_kernel, H=H, W=W),
        out_shape=jax.ShapeDtypeStruct((N, Cout, HWp), jnp.float32),
        grid=(N,),
        in_specs=[
            pl.BlockSpec((1, L), lambda n: (0, 0)),                  # mask
            pl.BlockSpec((1, Cin, L), lambda n: (n, 0, 0)),          # x
            pl.BlockSpec((9, Cout, Cin), lambda n: (0, 0, 0)),       # w1
            sb_spec, sb_spec,                                        # bn1
            pl.BlockSpec((9, Cout, Cout), lambda n: (0, 0, 0)),      # w2
            sb_spec, sb_spec,                                        # bn2
            pl.BlockSpec((9, Cout, Cout), lambda n: (0, 0, 0)),      # w3
            sb_spec, sb_spec,                                        # bn3
            pl.BlockSpec((Cout, Cin), lambda n: (0, 0)),             # wsc
            sb_spec, sb_spec,                                        # bn_sc
        ],
        out_specs=pl.BlockSpec((1, Cout, HWp), lambda n: (n, 0, 0)),
        scratch_shapes=[
            pltpu.VMEM((Cout, L), jnp.bfloat16),                     # h1
            pltpu.VMEM((Cout, L), jnp.bfloat16),                     # h2
        ],
        compiler_params=pltpu.CompilerParams(
            dimension_semantics=("parallel",),
            vmem_limit_bytes=vmem_limit),
    )(mask, x_pf, w1, s1, b1, w2, s2, b2, w3, s3, b3, wsc, ssc, bsc)

    # strip the two garbage pad columns per row -> (N, Cout, H, W)
    return out_flat.reshape(N, Cout, H, Wp)[:, :, :, :W]


# ------------------------------ parameter init --------------------------------

def init_params(key, in_planes, planes):
    """Kaiming-normal (fan_out, leaky_relu gain) convs; BN gamma=1, beta=0."""
    def conv_w(k, co, ci, ksz):
        fan_out = co * ksz * ksz
        gain = (2.0 / (1.0 + 0.01 ** 2)) ** 0.5
        std = gain / (fan_out ** 0.5)
        return std * jax.random.normal(k, (co, ci, ksz, ksz), jnp.float32)

    k1, k2, k3, k4 = jax.random.split(key, 4)
    p = {
        'w1': conv_w(k1, planes, in_planes, 3),
        'w2': conv_w(k2, planes, planes, 3),
        'w3': conv_w(k3, planes, planes, 3),
        'wsc': conv_w(k4, planes, in_planes, 1),
    }
    for name in ('bn1', 'bn2', 'bn3', 'bnsc'):
        p[name + '_g'] = jnp.ones((planes,), jnp.float32)
        p[name + '_b'] = jnp.zeros((planes,), jnp.float32)
    return p


# ----------------------------- plain-JAX reference ----------------------------

def reference_block(params, x):
    def bn(y, g, b):
        s = g / jnp.sqrt(1.0 + BN_EPS)
        return y * s[None, :, None, None] + b[None, :, None, None]

    def conv(y, w, pad):
        return jax.lax.conv_general_dilated(
            y, w, (1, 1), [(pad, pad), (pad, pad)],
            dimension_numbers=('NCHW', 'OIHW', 'NCHW'))

    out = jax.nn.leaky_relu(bn(conv(x, params['w1'], 1), params['bn1_g'], params['bn1_b']), 0.1)
    out = jax.nn.leaky_relu(bn(conv(out, params['w2'], 1), params['bn2_g'], params['bn2_b']), 0.1)
    out = bn(conv(out, params['w3'], 1), params['bn3_g'], params['bn3_b'])
    sc = bn(conv(x, params['wsc'], 0), params['bnsc_g'], params['bnsc_b'])
    return out + sc


# ---------------------------------- main --------------------------------------

if __name__ == "__main__":
    key = jax.random.PRNGKey(0)
    k_param, k_x = jax.random.split(key)

    batch, in_planes, planes, H, W = 2, 4, 8, 16, 16

    params = init_params(k_param, in_planes, planes)
    x = jax.random.normal(k_x, (batch, in_planes, H, W), jnp.float32)   # NCHW like PyTorch

    out = basic_block_forward(params, x)
    out = jax.block_until_ready(out)
    assert out.shape == (batch, planes, H, W)

    # validate against a pure-f32 JAX reference (loose tol: bf16 MXU inputs)
    ref = jax.block_until_ready(reference_block(params, x))
    max_ref = float(jnp.max(jnp.abs(ref)))
    err = float(jnp.max(jnp.abs(out - ref)))
    assert err <= 0.05 * max_ref + 0.05, f"mismatch: max_err={err}, ref_scale={max_ref}"

    print("KERNEL_OK")
</pallas_src>

<mosaic_0001>
module attributes {stable_mosaic.version = 11 : i64} {
  func.func @_fused_block_kernel(%arg0: i32, %arg1: memref<1x384xf32, #tpu.memory_space<vmem>>, %arg2: memref<1x4x384xbf16, #tpu.memory_space<vmem>>, %arg3: memref<9x8x4xbf16, #tpu.memory_space<vmem>>, %arg4: memref<8x1xf32, #tpu.memory_space<vmem>>, %arg5: memref<8x1xf32, #tpu.memory_space<vmem>>, %arg6: memref<9x8x8xbf16, #tpu.memory_space<vmem>>, %arg7: memref<8x1xf32, #tpu.memory_space<vmem>>, %arg8: memref<8x1xf32, #tpu.memory_space<vmem>>, %arg9: memref<9x8x8xbf16, #tpu.memory_space<vmem>>, %arg10: memref<8x1xf32, #tpu.memory_space<vmem>>, %arg11: memref<8x1xf32, #tpu.memory_space<vmem>>, %arg12: memref<8x4xbf16, #tpu.memory_space<vmem>>, %arg13: memref<8x1xf32, #tpu.memory_space<vmem>>, %arg14: memref<8x1xf32, #tpu.memory_space<vmem>>, %arg15: memref<1x8x288xf32, #tpu.memory_space<vmem>>, %arg16: memref<8x384xbf16, #tpu.memory_space<vmem>>, %arg17: memref<8x384xbf16, #tpu.memory_space<vmem>>) attributes {dimension_semantics = [#tpu.dimension_semantics<parallel>], iteration_bounds = array<i64: 2>, scalar_prefetch = 0 : i64, scratch_operands = 2 : i64, tpu.core_type = #tpu.core_type<tc>, window_params = [{pipeline_mode = #tpu.pipeline_mode<synchronous>, transform_indices = @transform_0, window_bounds = array<i64: 1, 384>}, {transform_indices = @transform_1, window_bounds = array<i64: 1, 4, 384>}, {pipeline_mode = #tpu.pipeline_mode<synchronous>, transform_indices = @transform_2, window_bounds = array<i64: 9, 8, 4>}, {pipeline_mode = #tpu.pipeline_mode<synchronous>, transform_indices = @transform_3, window_bounds = array<i64: 8, 1>}, {pipeline_mode = #tpu.pipeline_mode<synchronous>, transform_indices = @transform_4, window_bounds = array<i64: 8, 1>}, {pipeline_mode = #tpu.pipeline_mode<synchronous>, transform_indices = @transform_5, window_bounds = array<i64: 9, 8, 8>}, {pipeline_mode = #tpu.pipeline_mode<synchronous>, transform_indices = @transform_6, window_bounds = array<i64: 8, 1>}, {pipeline_mode = #tpu.pipeline_mode<synchronous>, transform_indices = @transform_7, window_bounds = array<i64: 8, 1>}, {pipeline_mode = #tpu.pipeline_mode<synchronous>, transform_indices = @transform_8, window_bounds = array<i64: 9, 8, 8>}, {pipeline_mode = #tpu.pipeline_mode<synchronous>, transform_indices = @transform_9, window_bounds = array<i64: 8, 1>}, {pipeline_mode = #tpu.pipeline_mode<synchronous>, transform_indices = @transform_10, window_bounds = array<i64: 8, 1>}, {pipeline_mode = #tpu.pipeline_mode<synchronous>, transform_indices = @transform_11, window_bounds = array<i64: 8, 4>}, {pipeline_mode = #tpu.pipeline_mode<synchronous>, transform_indices = @transform_12, window_bounds = array<i64: 8, 1>}, {pipeline_mode = #tpu.pipeline_mode<synchronous>, transform_indices = @transform_13, window_bounds = array<i64: 8, 1>}, {transform_indices = @transform_14, window_bounds = array<i64: 1, 8, 288>}]} {
    %c0 = arith.constant 0 : index
    %c0_0 = arith.constant 0 : index
    %0 = vector.load %arg1[%c0, %c0_0] : memref<1x384xf32, #tpu.memory_space<vmem>>, vector<1x288xf32>
    %cst = arith.constant 0.000000e+00 : bf16
    %1 = vector.broadcast %cst : bf16 to vector<8x384xbf16>
    %c0_1 = arith.constant 0 : index
    %c0_2 = arith.constant 0 : index
    %2 = vector.load %arg16[%c0_1, %c0_2] : memref<8x384xbf16, #tpu.memory_space<vmem>>, vector<8x384xbf16>
    tpu.vector_store %arg16[%c0_1, %c0_2], %1 {strides = array<i32>} : memref<8x384xbf16, #tpu.memory_space<vmem>>, vector<8x384xbf16>,
    %cst_3 = arith.constant 0.000000e+00 : bf16
    %3 = vector.broadcast %cst_3 : bf16 to vector<8x384xbf16>
    %c0_4 = arith.constant 0 : index
    %c0_5 = arith.constant 0 : index
    %4 = vector.load %arg17[%c0_4, %c0_5] : memref<8x384xbf16, #tpu.memory_space<vmem>>, vector<8x384xbf16>
    tpu.vector_store %arg17[%c0_4, %c0_5], %3 {strides = array<i32>} : memref<8x384xbf16, #tpu.memory_space<vmem>>, vector<8x384xbf16>,
    %cst_6 = arith.constant 0.000000e+00 : f32
    %5 = vector.broadcast %cst_6 : f32 to vector<8x288xf32>
    %c0_7 = arith.constant 0 : index
    %c0_8 = arith.constant 0 : index
    %c0_9 = arith.constant 0 : index
    %6 = vector.load %arg3[%c0_7, %c0_8, %c0_9] : memref<9x8x4xbf16, #tpu.memory_space<vmem>>, vector<1x8x4xbf16>
    %7 = vector.shape_cast %6 : vector<1x8x4xbf16> to vector<8x4xbf16>
    %c0_10 = arith.constant 0 : index
    %c0_11 = arith.constant 0 : index
    %c0_12 = arith.constant 0 : index
    %8 = vector.load %arg2[%c0_10, %c0_11, %c0_12] : memref<1x4x384xbf16, #tpu.memory_space<vmem>>, vector<1x4x288xbf16>
    %9 = vector.shape_cast %8 : vector<1x4x288xbf16> to vector<4x288xbf16>
    %cst_13 = arith.constant dense<0.000000e+00> : vector<8x288xf32>
    %10 = tpu.matmul %7, %9, %cst_13 {dimension_numbers = #tpu.dot_dimension_numbers<[1], [0], [0], [1], [0, 0, 1, 1], [], []>} : vector<8x4xbf16>, vector<4x288xbf16>, vector<8x288xf32> -> vector<8x288xf32>
    %11 = arith.addf %5, %10 : vector<8x288xf32>
    %c1 = arith.constant 1 : index
    %c0_14 = arith.constant 0 : index
    %c0_15 = arith.constant 0 : index
    %12 = vector.load %arg3[%c1, %c0_14, %c0_15] : memref<9x8x4xbf16, #tpu.memory_space<vmem>>, vector<1x8x4xbf16>
    %13 = vector.shape_cast %12 : vector<1x8x4xbf16> to vector<8x4xbf16>
    %c0_16 = arith.constant 0 : index
    %c0_17 = arith.constant 0 : index
    %c1_18 = arith.constant 1 : index
    %14 = vector.load %arg2[%c0_16, %c0_17, %c1_18] : memref<1x4x384xbf16, #tpu.memory_space<vmem>>, vector<1x4x288xbf16>
    %15 = vector.shape_cast %14 : vector<1x4x288xbf16> to vector<4x288xbf16>
    %cst_19 = arith.constant dense<0.000000e+00> : vector<8x288xf32>
    %16 = tpu.matmul %13, %15, %cst_19 {dimension_numbers = #tpu.dot_dimension_numbers<[1], [0], [0], [1], [0, 0, 1, 1], [], []>} : vector<8x4xbf16>, vector<4x288xbf16>, vector<8x288xf32> -> vector<8x288xf32>
    %17 = arith.addf %11, %16 : vector<8x288xf32>
    %c2 = arith.constant 2 : index
    %c0_20 = arith.constant 0 : index
    %c0_21 = arith.constant 0 : index
    %18 = vector.load %arg3[%c2, %c0_20, %c0_21] : memref<9x8x4xbf16, #tpu.memory_space<vmem>>, vector<1x8x4xbf16>
    %19 = vector.shape_cast %18 : vector<1x8x4xbf16> to vector<8x4xbf16>
    %c0_22 = arith.constant 0 : index
    %c0_23 = arith.constant 0 : index
    %c2_24 = arith.constant 2 : index
    %20 = vector.load %arg2[%c0_22, %c0_23, %c2_24] : memref<1x4x384xbf16, #tpu.memory_space<vmem>>, vector<1x4x288xbf16>
    %21 = vector.shape_cast %20 : vector<1x4x288xbf16> to vector<4x288xbf16>
    %cst_25 = arith.constant dense<0.000000e+00> : vector<8x288xf32>
    %22 = tpu.matmul %19, %21, %cst_25 {dimension_numbers = #tpu.dot_dimension_numbers<[1], [0], [0], [1], [0, 0, 1, 1], [], []>} : vector<8x4xbf16>, vector<4x288xbf16>, vector<8x288xf32> -> vector<8x288xf32>
    %23 = arith.addf %17, %22 : vector<8x288xf32>
    %c3 = arith.constant 3 : index
    %c0_26 = arith.constant 0 : index
    %c0_27 = arith.constant 0 : index
    %24 = vector.load %arg3[%c3, %c0_26, %c0_27] : memref<9x8x4xbf16, #tpu.memory_space<vmem>>, vector<1x8x4xbf16>
    %25 = vector.shape_cast %24 : vector<1x8x4xbf16> to vector<8x4xbf16>
    %c0_28 = arith.constant 0 : index
    %c0_29 = arith.constant 0 : index
    %c18 = arith.constant 18 : index
    %26 = vector.load %arg2[%c0_28, %c0_29, %c18] : memref<1x4x384xbf16, #tpu.memory_space<vmem>>, vector<1x4x288xbf16>
    %27 = vector.shape_cast %26 : vector<1x4x288xbf16> to vector<4x288xbf16>
    %cst_30 = arith.constant dense<0.000000e+00> : vector<8x288xf32>
    %28 = tpu.matmul %25, %27, %cst_30 {dimension_numbers = #tpu.dot_dimension_numbers<[1], [0], [0], [1], [0, 0, 1, 1], [], []>} : vector<8x4xbf16>, vector<4x288xbf16>, vector<8x288xf32> -> vector<8x288xf32>
    %29 = arith.addf %23, %28 : vector<8x288xf32>
    %c4 = arith.constant 4 : index
    %c0_31 = arith.constant 0 : index
    %c0_32 = arith.constant 0 : index
    %30 = vector.load %arg3[%c4, %c0_31, %c0_32] : memref<9x8x4xbf16, #tpu.memory_space<vmem>>, vector<1x8x4xbf16>
    %31 = vector.shape_cast %30 : vector<1x8x4xbf16> to vector<8x4xbf16>
    %c0_33 = arith.constant 0 : index
    %c0_34 = arith.constant 0 : index
    %c19 = arith.constant 19 : index
    %32 = vector.load %arg2[%c0_33, %c0_34, %c19] : memref<1x4x384xbf16, #tpu.memory_space<vmem>>, vector<1x4x288xbf16>
    %33 = vector.shape_cast %32 : vector<1x4x288xbf16> to vector<4x288xbf16>
    %cst_35 = arith.constant dense<0.000000e+00> : vector<8x288xf32>
    %34 = tpu.matmul %31, %33, %cst_35 {dimension_numbers = #tpu.dot_dimension_numbers<[1], [0], [0], [1], [0, 0, 1, 1], [], []>} : vector<8x4xbf16>, vector<4x288xbf16>, vector<8x288xf32> -> vector<8x288xf32>
    %35 = arith.addf %29, %34 : vector<8x288xf32>
    %c5 = arith.constant 5 : index
    %c0_36 = arith.constant 0 : index
    %c0_37 = arith.constant 0 : index
    %36 = vector.load %arg3[%c5, %c0_36, %c0_37] : memref<9x8x4xbf16, #tpu.memory_space<vmem>>, vector<1x8x4xbf16>
    %37 = vector.shape_cast %36 : vector<1x8x4xbf16> to vector<8x4xbf16>
    %c0_38 = arith.constant 0 : index
    %c0_39 = arith.constant 0 : index
    %c20 = arith.constant 20 : index
    %38 = vector.load %arg2[%c0_38, %c0_39, %c20] : memref<1x4x384xbf16, #tpu.memory_space<vmem>>, vector<1x4x288xbf16>
    %39 = vector.shape_cast %38 : vector<1x4x288xbf16> to vector<4x288xbf16>
    %cst_40 = arith.constant dense<0.000000e+00> : vector<8x288xf32>
    %40 = tpu.matmul %37, %39, %cst_40 {dimension_numbers = #tpu.dot_dimension_numbers<[1], [0], [0], [1], [0, 0, 1, 1], [], []>} : vector<8x4xbf16>, vector<4x288xbf16>, vector<8x288xf32> -> vector<8x288xf32>
    %41 = arith.addf %35, %40 : vector<8x288xf32>
    %c6 = arith.constant 6 : index
    %c0_41 = arith.constant 0 : index
    %c0_42 = arith.constant 0 : index
    %42 = vector.load %arg3[%c6, %c0_41, %c0_42] : memref<9x8x4xbf16, #tpu.memory_space<vmem>>, vector<1x8x4xbf16>
    %43 = vector.shape_cast %42 : vector<1x8x4xbf16> to vector<8x4xbf16>
    %c0_43 = arith.constant 0 : index
    %c0_44 = arith.constant 0 : index
    %c36 = arith.constant 36 : index
    %44 = vector.load %arg2[%c0_43, %c0_44, %c36] : memref<1x4x384xbf16, #tpu.memory_space<vmem>>, vector<1x4x288xbf16>
    %45 = vector.shape_cast %44 : vector<1x4x288xbf16> to vector<4x288xbf16>
    %cst_45 = arith.constant dense<0.000000e+00> : vector<8x288xf32>
    %46 = tpu.matmul %43, %45, %cst_45 {dimension_numbers = #tpu.dot_dimension_numbers<[1], [0], [0], [1], [0, 0, 1, 1], [], []>} : vector<8x4xbf16>, vector<4x288xbf16>, vector<8x288xf32> -> vector<8x288xf32>
    %47 = arith.addf %41, %46 : vector<8x288xf32>
    %c7 = arith.constant 7 : index
    %c0_46 = arith.constant 0 : index
    %c0_47 = arith.constant 0 : index
    %48 = vector.load %arg3[%c7, %c0_46, %c0_47] : memref<9x8x4xbf16, #tpu.memory_space<vmem>>, vector<1x8x4xbf16>
    %49 = vector.shape_cast %48 : vector<1x8x4xbf16> to vector<8x4xbf16>
    %c0_48 = arith.constant 0 : index
    %c0_49 = arith.constant 0 : index
    %c37 = arith.constant 37 : index
    %50 = vector.load %arg2[%c0_48, %c0_49, %c37] : memref<1x4x384xbf16, #tpu.memory_space<vmem>>, vector<1x4x288xbf16>
    %51 = vector.shape_cast %50 : vector<1x4x288xbf16> to vector<4x288xbf16>
    %cst_50 = arith.constant dense<0.000000e+00> : vector<8x288xf32>
    %52 = tpu.matmul %49, %51, %cst_50 {dimension_numbers = #tpu.dot_dimension_numbers<[1], [0], [0], [1], [0, 0, 1, 1], [], []>} : vector<8x4xbf16>, vector<4x288xbf16>, vector<8x288xf32> -> vector<8x288xf32>
    %53 = arith.addf %47, %52 : vector<8x288xf32>
    %c8 = arith.constant 8 : index
    %c0_51 = arith.constant 0 : index
    %c0_52 = arith.constant 0 : index
    %54 = vector.load %arg3[%c8, %c0_51, %c0_52] : memref<9x8x4xbf16, #tpu.memory_space<vmem>>, vector<1x8x4xbf16>
    %55 = vector.shape_cast %54 : vector<1x8x4xbf16> to vector<8x4xbf16>
    %c0_53 = arith.constant 0 : index
    %c0_54 = arith.constant 0 : index
    %c38 = arith.constant 38 : index
    %56 = vector.load %arg2[%c0_53, %c0_54, %c38] : memref<1x4x384xbf16, #tpu.memory_space<vmem>>, vector<1x4x288xbf16>
    %57 = vector.shape_cast %56 : vector<1x4x288xbf16> to vector<4x288xbf16>
    %cst_55 = arith.constant dense<0.000000e+00> : vector<8x288xf32>
    %58 = tpu.matmul %55, %57, %cst_55 {dimension_numbers = #tpu.dot_dimension_numbers<[1], [0], [0], [1], [0, 0, 1, 1], [], []>} : vector<8x4xbf16>, vector<4x288xbf16>, vector<8x288xf32> -> vector<8x288xf32>
    %59 = arith.addf %53, %58 : vector<8x288xf32>
    %c0_56 = arith.constant 0 : index
    %c0_57 = arith.constant 0 : index
    %60 = vector.load %arg4[%c0_56, %c0_57] : memref<8x1xf32, #tpu.memory_space<vmem>>, vector<8x1xf32>
    %61 = vector.broadcast %60 : vector<8x1xf32> to vector<8x288xf32>
    %62 = arith.mulf %59, %61 : vector<8x288xf32>
    %c0_58 = arith.constant 0 : index
    %c0_59 = arith.constant 0 : index
    %63 = vector.load %arg5[%c0_58, %c0_59] : memref<8x1xf32, #tpu.memory_space<vmem>>, vector<8x1xf32>
    %64 = vector.broadcast %63 : vector<8x1xf32> to vector<8x288xf32>
    %65 = arith.addf %62, %64 : vector<8x288xf32>
    %cst_60 = arith.constant 0.000000e+00 : f32
    %66 = vector.broadcast %cst_60 : f32 to vector<8x288xf32>
    %67 = arith.cmpf ogt, %65, %66 : vector<8x288xf32>
    %cst_61 = arith.constant 1.000000e-01 : f32
    %68 = vector.broadcast %cst_61 : f32 to vector<8x288xf32>
    %69 = arith.mulf %68, %65 : vector<8x288xf32>
    %70 = arith.select %67, %65, %69 : vector<8x288xi1>, vector<8x288xf32>
    %71 = vector.broadcast %0 : vector<1x288xf32> to vector<8x288xf32>
    %72 = arith.mulf %70, %71 : vector<8x288xf32>
    %73 = arith.truncf %72 : vector<8x288xf32> to vector<8x288xbf16>
    %c0_62 = arith.constant 0 : index
    %c19_63 = arith.constant 19 : index
    %74 = vector.load %arg16[%c0_62, %c19_63] : memref<8x384xbf16, #tpu.memory_space<vmem>>, vector<8x288xbf16>
    tpu.vector_store %arg16[%c0_62, %c19_63], %73 {strides = array<i32>} : memref<8x384xbf16, #tpu.memory_space<vmem>>, vector<8x288xbf16>,
    %cst_64 = arith.constant 0.000000e+00 : f32
    %75 = vector.broadcast %cst_64 : f32 to vector<8x288xf32>
    %c0_65 = arith.constant 0 : index
    %c0_66 = arith.constant 0 : index
    %c0_67 = arith.constant 0 : index
    %76 = vector.load %arg6[%c0_65, %c0_66, %c0_67] : memref<9x8x8xbf16, #tpu.memory_space<vmem>>, vector<1x8x8xbf16>
    %77 = vector.shape_cast %76 : vector<1x8x8xbf16> to vector<8x8xbf16>
    %c0_68 = arith.constant 0 : index
    %c0_69 = arith.constant 0 : index
    %78 = vector.load %arg16[%c0_68, %c0_69] : memref<8x384xbf16, #tpu.memory_space<vmem>>, vector<8x288xbf16>
    %cst_70 = arith.constant dense<0.000000e+00> : vector<8x288xf32>
    %79 = tpu.matmul %77, %78, %cst_70 {dimension_numbers = #tpu.dot_dimension_numbers<[1], [0], [0], [1], [0, 0, 1, 1], [], []>} : vector<8x8xbf16>, vector<8x288xbf16>, vector<8x288xf32> -> vector<8x288xf32>
    %80 = arith.addf %75, %79 : vector<8x288xf32>
    %c1_71 = arith.constant 1 : index
    %c0_72 = arith.constant 0 : index
    %c0_73 = arith.constant 0 : index
    %81 = vector.load %arg6[%c1_71, %c0_72, %c0_73] : memref<9x8x8xbf16, #tpu.memory_space<vmem>>, vector<1x8x8xbf16>
    %82 = vector.shape_cast %81 : vector<1x8x8xbf16> to vector<8x8xbf16>
    %c0_74 = arith.constant 0 : index
    %c1_75 = arith.constant 1 : index
    %83 = vector.load %arg16[%c0_74, %c1_75] : memref<8x384xbf16, #tpu.memory_space<vmem>>, vector<8x288xbf16>
    %cst_76 = arith.constant dense<0.000000e+00> : vector<8x288xf32>
    %84 = tpu.matmul %82, %83, %cst_76 {dimension_numbers = #tpu.dot_dimension_numbers<[1], [0], [0], [1], [0, 0, 1, 1], [], []>} : vector<8x8xbf16>, vector<8x288xbf16>, vector<8x288xf32> -> vector<8x288xf32>
    %85 = arith.addf %80, %84 : vector<8x288xf32>
    %c2_77 = arith.constant 2 : index
    %c0_78 = arith.constant 0 : index
    %c0_79 = arith.constant 0 : index
    %86 = vector.load %arg6[%c2_77, %c0_78, %c0_79] : memref<9x8x8xbf16, #tpu.memory_space<vmem>>, vector<1x8x8xbf16>
    %87 = vector.shape_cast %86 : vector<1x8x8xbf16> to vector<8x8xbf16>
    %c0_80 = arith.constant 0 : index
    %c2_81 = arith.constant 2 : index
    %88 = vector.load %arg16[%c0_80, %c2_81] : memref<8x384xbf16, #tpu.memory_space<vmem>>, vector<8x288xbf16>
    %cst_82 = arith.constant dense<0.000000e+00> : vector<8x288xf32>
    %89 = tpu.matmul %87, %88, %cst_82 {dimension_numbers = #tpu.dot_dimension_numbers<[1], [0], [0], [1], [0, 0, 1, 1], [], []>} : vector<8x8xbf16>, vector<8x288xbf16>, vector<8x288xf32> -> vector<8x288xf32>
    %90 = arith.addf %85, %89 : vector<8x288xf32>
    %c3_83 = arith.constant 3 : index
    %c0_84 = arith.constant 0 : index
    %c0_85 = arith.constant 0 : index
    %91 = vector.load %arg6[%c3_83, %c0_84, %c0_85] : memref<9x8x8xbf16, #tpu.memory_space<vmem>>, vector<1x8x8xbf16>
    %92 = vector.shape_cast %91 : vector<1x8x8xbf16> to vector<8x8xbf16>
    %c0_86 = arith.constant 0 : index
    %c18_87 = arith.constant 18 : index
    %93 = vector.load %arg16[%c0_86, %c18_87] : memref<8x384xbf16, #tpu.memory_space<vmem>>, vector<8x288xbf16>
    %cst_88 = arith.constant dense<0.000000e+00> : vector<8x288xf32>
    %94 = tpu.matmul %92, %93, %cst_88 {dimension_numbers = #tpu.dot_dimension_numbers<[1], [0], [0], [1], [0, 0, 1, 1], [], []>} : vector<8x8xbf16>, vector<8x288xbf16>, vector<8x288xf32> -> vector<8x288xf32>
    %95 = arith.addf %90, %94 : vector<8x288xf32>
    %c4_89 = arith.constant 4 : index
    %c0_90 = arith.constant 0 : index
    %c0_91 = arith.constant 0 : index
    %96 = vector.load %arg6[%c4_89, %c0_90, %c0_91] : memref<9x8x8xbf16, #tpu.memory_space<vmem>>, vector<1x8x8xbf16>
    %97 = vector.shape_cast %96 : vector<1x8x8xbf16> to vector<8x8xbf16>
    %c0_92 = arith.constant 0 : index
    %c19_93 = arith.constant 19 : index
    %98 = vector.load %arg16[%c0_92, %c19_93] : memref<8x384xbf16, #tpu.memory_space<vmem>>, vector<8x288xbf16>
    %cst_94 = arith.constant dense<0.000000e+00> : vector<8x288xf32>
    %99 = tpu.matmul %97, %98, %cst_94 {dimension_numbers = #tpu.dot_dimension_numbers<[1], [0], [0], [1], [0, 0, 1, 1], [], []>} : vector<8x8xbf16>, vector<8x288xbf16>, vector<8x288xf32> -> vector<8x288xf32>
    %100 = arith.addf %95, %99 : vector<8x288xf32>
    %c5_95 = arith.constant 5 : index
    %c0_96 = arith.constant 0 : index
    %c0_97 = arith.constant 0 : index
    %101 = vector.load %arg6[%c5_95, %c0_96, %c0_97] : memref<9x8x8xbf16, #tpu.memory_space<vmem>>, vector<1x8x8xbf16>
    %102 = vector.shape_cast %101 : vector<1x8x8xbf16> to vector<8x8xbf16>
    %c0_98 = arith.constant 0 : index
    %c20_99 = arith.constant 20 : index
    %103 = vector.load %arg16[%c0_98, %c20_99] : memref<8x384xbf16, #tpu.memory_space<vmem>>, vector<8x288xbf16>
    %cst_100 = arith.constant dense<0.000000e+00> : vector<8x288xf32>
    %104 = tpu.matmul %102, %103, %cst_100 {dimension_numbers = #tpu.dot_dimension_numbers<[1], [0], [0], [1], [0, 0, 1, 1], [], []>} : vector<8x8xbf16>, vector<8x288xbf16>, vector<8x288xf32> -> vector<8x288xf32>
    %105 = arith.addf %100, %104 : vector<8x288xf32>
    %c6_101 = arith.constant 6 : index
    %c0_102 = arith.constant 0 : index
    %c0_103 = arith.constant 0 : index
    %106 = vector.load %arg6[%c6_101, %c0_102, %c0_103] : memref<9x8x8xbf16, #tpu.memory_space<vmem>>, vector<1x8x8xbf16>
    %107 = vector.shape_cast %106 : vector<1x8x8xbf16> to vector<8x8xbf16>
    %c0_104 = arith.constant 0 : index
    %c36_105 = arith.constant 36 : index
    %108 = vector.load %arg16[%c0_104, %c36_105] : memref<8x384xbf16, #tpu.memory_space<vmem>>, vector<8x288xbf16>
    %cst_106 = arith.constant dense<0.000000e+00> : vector<8x288xf32>
    %109 = tpu.matmul %107, %108, %cst_106 {dimension_numbers = #tpu.dot_dimension_numbers<[1], [0], [0], [1], [0, 0, 1, 1], [], []>} : vector<8x8xbf16>, vector<8x288xbf16>, vector<8x288xf32> -> vector<8x288xf32>
    %110 = arith.addf %105, %109 : vector<8x288xf32>
    %c7_107 = arith.constant 7 : index
    %c0_108 = arith.constant 0 : index
    %c0_109 = arith.constant 0 : index
    %111 = vector.load %arg6[%c7_107, %c0_108, %c0_109] : memref<9x8x8xbf16, #tpu.memory_space<vmem>>, vector<1x8x8xbf16>
    %112 = vector.shape_cast %111 : vector<1x8x8xbf16> to vector<8x8xbf16>
    %c0_110 = arith.constant 0 : index
    %c37_111 = arith.constant 37 : index
    %113 = vector.load %arg16[%c0_110, %c37_111] : memref<8x384xbf16, #tpu.memory_space<vmem>>, vector<8x288xbf16>
    %cst_112 = arith.constant dense<0.000000e+00> : vector<8x288xf32>
    %114 = tpu.matmul %112, %113, %cst_112 {dimension_numbers = #tpu.dot_dimension_numbers<[1], [0], [0], [1], [0, 0, 1, 1], [], []>} : vector<8x8xbf16>, vector<8x288xbf16>, vector<8x288xf32> -> vector<8x288xf32>
    %115 = arith.addf %110, %114 : vector<8x288xf32>
    %c8_113 = arith.constant 8 : index
    %c0_114 = arith.constant 0 : index
    %c0_115 = arith.constant 0 : index
    %116 = vector.load %arg6[%c8_113, %c0_114, %c0_115] : memref<9x8x8xbf16, #tpu.memory_space<vmem>>, vector<1x8x8xbf16>
    %117 = vector.shape_cast %116 : vector<1x8x8xbf16> to vector<8x8xbf16>
    %c0_116 = arith.constant 0 : index
    %c38_117 = arith.constant 38 : index
    %118 = vector.load %arg16[%c0_116, %c38_117] : memref<8x384xbf16, #tpu.memory_space<vmem>>, vector<8x288xbf16>
    %cst_118 = arith.constant dense<0.000000e+00> : vector<8x288xf32>
    %119 = tpu.matmul %117, %118, %cst_118 {dimension_numbers = #tpu.dot_dimension_numbers<[1], [0], [0], [1], [0, 0, 1, 1], [], []>} : vector<8x8xbf16>, vector<8x288xbf16>, vector<8x288xf32> -> vector<8x288xf32>
    %120 = arith.addf %115, %119 : vector<8x288xf32>
    %c0_119 = arith.constant 0 : index
    %c0_120 = arith.constant 0 : index
    %121 = vector.load %arg7[%c0_119, %c0_120] : memref<8x1xf32, #tpu.memory_space<vmem>>, vector<8x1xf32>
    %122 = vector.broadcast %121 : vector<8x1xf32> to vector<8x288xf32>
    %123 = arith.mulf %120, %122 : vector<8x288xf32>
    %c0_121 = arith.constant 0 : index
    %c0_122 = arith.constant 0 : index
    %124 = vector.load %arg8[%c0_121, %c0_122] : memref<8x1xf32, #tpu.memory_space<vmem>>, vector<8x1xf32>
    %125 = vector.broadcast %124 : vector<8x1xf32> to vector<8x288xf32>
    %126 = arith.addf %123, %125 : vector<8x288xf32>
    %cst_123 = arith.constant 0.000000e+00 : f32
    %127 = vector.broadcast %cst_123 : f32 to vector<8x288xf32>
    %128 = arith.cmpf ogt, %126, %127 : vector<8x288xf32>
    %cst_124 = arith.constant 1.000000e-01 : f32
    %129 = vector.broadcast %cst_124 : f32 to vector<8x288xf32>
    %130 = arith.mulf %129, %126 : vector<8x288xf32>
    %131 = arith.select %128, %126, %130 : vector<8x288xi1>, vector<8x288xf32>
    %132 = vector.broadcast %0 : vector<1x288xf32> to vector<8x288xf32>
    %133 = arith.mulf %131, %132 : vector<8x288xf32>
    %134 = arith.truncf %133 : vector<8x288xf32> to vector<8x288xbf16>
    %c0_125 = arith.constant 0 : index
    %c19_126 = arith.constant 19 : index
    %135 = vector.load %arg17[%c0_125, %c19_126] : memref<8x384xbf16, #tpu.memory_space<vmem>>, vector<8x288xbf16>
    tpu.vector_store %arg17[%c0_125, %c19_126], %134 {strides = array<i32>} : memref<8x384xbf16, #tpu.memory_space<vmem>>, vector<8x288xbf16>,
    %cst_127 = arith.constant 0.000000e+00 : f32
    %136 = vector.broadcast %cst_127 : f32 to vector<8x288xf32>
    %c0_128 = arith.constant 0 : index
    %c0_129 = arith.constant 0 : index
    %c0_130 = arith.constant 0 : index
    %137 = vector.load %arg9[%c0_128, %c0_129, %c0_130] : memref<9x8x8xbf16, #tpu.memory_space<vmem>>, vector<1x8x8xbf16>
    %138 = vector.shape_cast %137 : vector<1x8x8xbf16> to vector<8x8xbf16>
    %c0_131 = arith.constant 0 : index
    %c0_132 = arith.constant 0 : index
    %139 = vector.load %arg17[%c0_131, %c0_132] : memref<8x384xbf16, #tpu.memory_space<vmem>>, vector<8x288xbf16>
    %cst_133 = arith.constant dense<0.000000e+00> : vector<8x288xf32>
    %140 = tpu.matmul %138, %139, %cst_133 {dimension_numbers = #tpu.dot_dimension_numbers<[1], [0], [0], [1], [0, 0, 1, 1], [], []>} : vector<8x8xbf16>, vector<8x288xbf16>, vector<8x288xf32> -> vector<8x288xf32>
    %141 = arith.addf %136, %140 : vector<8x288xf32>
    %c1_134 = arith.constant 1 : index
    %c0_135 = arith.constant 0 : index
    %c0_136 = arith.constant 0 : index
    %142 = vector.load %arg9[%c1_134, %c0_135, %c0_136] : memref<9x8x8xbf16, #tpu.memory_space<vmem>>, vector<1x8x8xbf16>
    %143 = vector.shape_cast %142 : vector<1x8x8xbf16> to vector<8x8xbf16>
    %c0_137 = arith.constant 0 : index
    %c1_138 = arith.constant 1 : index
    %144 = vector.load %arg17[%c0_137, %c1_138] : memref<8x384xbf16, #tpu.memory_space<vmem>>, vector<8x288xbf16>
    %cst_139 = arith.constant dense<0.000000e+00> : vector<8x288xf32>
    %145 = tpu.matmul %143, %144, %cst_139 {dimension_numbers = #tpu.dot_dimension_numbers<[1], [0], [0], [1], [0, 0, 1, 1], [], []>} : vector<8x8xbf16>, vector<8x288xbf16>, vector<8x288xf32> -> vector<8x288xf32>
    %146 = arith.addf %141, %145 : vector<8x288xf32>
    %c2_140 = arith.constant 2 : index
    %c0_141 = arith.constant 0 : index
    %c0_142 = arith.constant 0 : index
    %147 = vector.load %arg9[%c2_140, %c0_141, %c0_142] : memref<9x8x8xbf16, #tpu.memory_space<vmem>>, vector<1x8x8xbf16>
    %148 = vector.shape_cast %147 : vector<1x8x8xbf16> to vector<8x8xbf16>
    %c0_143 = arith.constant 0 : index
    %c2_144 = arith.constant 2 : index
    %149 = vector.load %arg17[%c0_143, %c2_144] : memref<8x384xbf16, #tpu.memory_space<vmem>>, vector<8x288xbf16>
    %cst_145 = arith.constant dense<0.000000e+00> : vector<8x288xf32>
    %150 = tpu.matmul %148, %149, %cst_145 {dimension_numbers = #tpu.dot_dimension_numbers<[1], [0], [0], [1], [0, 0, 1, 1], [], []>} : vector<8x8xbf16>, vector<8x288xbf16>, vector<8x288xf32> -> vector<8x288xf32>
    %151 = arith.addf %146, %150 : vector<8x288xf32>
    %c3_146 = arith.constant 3 : index
    %c0_147 = arith.constant 0 : index
    %c0_148 = arith.constant 0 : index
    %152 = vector.load %arg9[%c3_146, %c0_147, %c0_148] : memref<9x8x8xbf16, #tpu.memory_space<vmem>>, vector<1x8x8xbf16>
    %153 = vector.shape_cast %152 : vector<1x8x8xbf16> to vector<8x8xbf16>
    %c0_149 = arith.constant 0 : index
    %c18_150 = arith.constant 18 : index
    %154 = vector.load %arg17[%c0_149, %c18_150] : memref<8x384xbf16, #tpu.memory_space<vmem>>, vector<8x288xbf16>
    %cst_151 = arith.constant dense<0.000000e+00> : vector<8x288xf32>
    %155 = tpu.matmul %153, %154, %cst_151 {dimension_numbers = #tpu.dot_dimension_numbers<[1], [0], [0], [1], [0, 0, 1, 1], [], []>} : vector<8x8xbf16>, vector<8x288xbf16>, vector<8x288xf32> -> vector<8x288xf32>
    %156 = arith.addf %151, %155 : vector<8x288xf32>
    %c4_152 = arith.constant 4 : index
    %c0_153 = arith.constant 0 : index
    %c0_154 = arith.constant 0 : index
    %157 = vector.load %arg9[%c4_152, %c0_153, %c0_154] : memref<9x8x8xbf16, #tpu.memory_space<vmem>>, vector<1x8x8xbf16>
    %158 = vector.shape_cast %157 : vector<1x8x8xbf16> to vector<8x8xbf16>
    %c0_155 = arith.constant 0 : index
    %c19_156 = arith.constant 19 : index
    %159 = vector.load %arg17[%c0_155, %c19_156] : memref<8x384xbf16, #tpu.memory_space<vmem>>, vector<8x288xbf16>
    %cst_157 = arith.constant dense<0.000000e+00> : vector<8x288xf32>
    %160 = tpu.matmul %158, %159, %cst_157 {dimension_numbers = #tpu.dot_dimension_numbers<[1], [0], [0], [1], [0, 0, 1, 1], [], []>} : vector<8x8xbf16>, vector<8x288xbf16>, vector<8x288xf32> -> vector<8x288xf32>
    %161 = arith.addf %156, %160 : vector<8x288xf32>
    %c5_158 = arith.constant 5 : index
    %c0_159 = arith.constant 0 : index
    %c0_160 = arith.constant 0 : index
    %162 = vector.load %arg9[%c5_158, %c0_159, %c0_160] : memref<9x8x8xbf16, #tpu.memory_space<vmem>>, vector<1x8x8xbf16>
    %163 = vector.shape_cast %162 : vector<1x8x8xbf16> to vector<8x8xbf16>
    %c0_161 = arith.constant 0 : index
    %c20_162 = arith.constant 20 : index
    %164 = vector.load %arg17[%c0_161, %c20_162] : memref<8x384xbf16, #tpu.memory_space<vmem>>, vector<8x288xbf16>
    %cst_163 = arith.constant dense<0.000000e+00> : vector<8x288xf32>
    %165 = tpu.matmul %163, %164, %cst_163 {dimension_numbers = #tpu.dot_dimension_numbers<[1], [0], [0], [1], [0, 0, 1, 1], [], []>} : vector<8x8xbf16>, vector<8x288xbf16>, vector<8x288xf32> -> vector<8x288xf32>
    %166 = arith.addf %161, %165 : vector<8x288xf32>
    %c6_164 = arith.constant 6 : index
    %c0_165 = arith.constant 0 : index
    %c0_166 = arith.constant 0 : index
    %167 = vector.load %arg9[%c6_164, %c0_165, %c0_166] : memref<9x8x8xbf16, #tpu.memory_space<vmem>>, vector<1x8x8xbf16>
    %168 = vector.shape_cast %167 : vector<1x8x8xbf16> to vector<8x8xbf16>
    %c0_167 = arith.constant 0 : index
    %c36_168 = arith.constant 36 : index
    %169 = vector.load %arg17[%c0_167, %c36_168] : memref<8x384xbf16, #tpu.memory_space<vmem>>, vector<8x288xbf16>
    %cst_169 = arith.constant dense<0.000000e+00> : vector<8x288xf32>
    %170 = tpu.matmul %168, %169, %cst_169 {dimension_numbers = #tpu.dot_dimension_numbers<[1], [0], [0], [1], [0, 0, 1, 1], [], []>} : vector<8x8xbf16>, vector<8x288xbf16>, vector<8x288xf32> -> vector<8x288xf32>
    %171 = arith.addf %166, %170 : vector<8x288xf32>
    %c7_170 = arith.constant 7 : index
    %c0_171 = arith.constant 0 : index
    %c0_172 = arith.constant 0 : index
    %172 = vector.load %arg9[%c7_170, %c0_171, %c0_172] : memref<9x8x8xbf16, #tpu.memory_space<vmem>>, vector<1x8x8xbf16>
    %173 = vector.shape_cast %172 : vector<1x8x8xbf16> to vector<8x8xbf16>
    %c0_173 = arith.constant 0 : index
    %c37_174 = arith.constant 37 : index
    %174 = vector.load %arg17[%c0_173, %c37_174] : memref<8x384xbf16, #tpu.memory_space<vmem>>, vector<8x288xbf16>
    %cst_175 = arith.constant dense<0.000000e+00> : vector<8x288xf32>
    %175 = tpu.matmul %173, %174, %cst_175 {dimension_numbers = #tpu.dot_dimension_numbers<[1], [0], [0], [1], [0, 0, 1, 1], [], []>} : vector<8x8xbf16>, vector<8x288xbf16>, vector<8x288xf32> -> vector<8x288xf32>
    %176 = arith.addf %171, %175 : vector<8x288xf32>
    %c8_176 = arith.constant 8 : index
    %c0_177 = arith.constant 0 : index
    %c0_178 = arith.constant 0 : index
    %177 = vector.load %arg9[%c8_176, %c0_177, %c0_178] : memref<9x8x8xbf16, #tpu.memory_space<vmem>>, vector<1x8x8xbf16>
    %178 = vector.shape_cast %177 : vector<1x8x8xbf16> to vector<8x8xbf16>
    %c0_179 = arith.constant 0 : index
    %c38_180 = arith.constant 38 : index
    %179 = vector.load %arg17[%c0_179, %c38_180] : memref<8x384xbf16, #tpu.memory_space<vmem>>, vector<8x288xbf16>
    %cst_181 = arith.constant dense<0.000000e+00> : vector<8x288xf32>
    %180 = tpu.matmul %178, %179, %cst_181 {dimension_numbers = #tpu.dot_dimension_numbers<[1], [0], [0], [1], [0, 0, 1, 1], [], []>} : vector<8x8xbf16>, vector<8x288xbf16>, vector<8x288xf32> -> vector<8x288xf32>
    %181 = arith.addf %176, %180 : vector<8x288xf32>
    %c0_182 = arith.constant 0 : index
    %c0_183 = arith.constant 0 : index
    %182 = vector.load %arg10[%c0_182, %c0_183] : memref<8x1xf32, #tpu.memory_space<vmem>>, vector<8x1xf32>
    %183 = vector.broadcast %182 : vector<8x1xf32> to vector<8x288xf32>
    %184 = arith.mulf %181, %183 : vector<8x288xf32>
    %c0_184 = arith.constant 0 : index
    %c0_185 = arith.constant 0 : index
    %185 = vector.load %arg11[%c0_184, %c0_185] : memref<8x1xf32, #tpu.memory_space<vmem>>, vector<8x1xf32>
    %186 = vector.broadcast %185 : vector<8x1xf32> to vector<8x288xf32>
    %187 = arith.addf %184, %186 : vector<8x288xf32>
    %c0_186 = arith.constant 0 : index
    %c0_187 = arith.constant 0 : index
    %c19_188 = arith.constant 19 : index
    %188 = vector.load %arg2[%c0_186, %c0_187, %c19_188] : memref<1x4x384xbf16, #tpu.memory_space<vmem>>, vector<1x4x288xbf16>
    %189 = vector.shape_cast %188 : vector<1x4x288xbf16> to vector<4x288xbf16>
    %c0_189 = arith.constant 0 : index
    %c0_190 = arith.constant 0 : index
    %190 = vector.load %arg12[%c0_189, %c0_190] : memref<8x4xbf16, #tpu.memory_space<vmem>>, vector<8x4xbf16>
    %cst_191 = arith.constant dense<0.000000e+00> : vector<8x288xf32>
    %191 = tpu.matmul %190, %189, %cst_191 {dimension_numbers = #tpu.dot_dimension_numbers<[1], [0], [0], [1], [0, 0, 1, 1], [], []>} : vector<8x4xbf16>, vector<4x288xbf16>, vector<8x288xf32> -> vector<8x288xf32>
    %c0_192 = arith.constant 0 : index
    %c0_193 = arith.constant 0 : index
    %192 = vector.load %arg13[%c0_192, %c0_193] : memref<8x1xf32, #tpu.memory_space<vmem>>, vector<8x1xf32>
    %193 = vector.broadcast %192 : vector<8x1xf32> to vector<8x288xf32>
    %194 = arith.mulf %191, %193 : vector<8x288xf32>
    %195 = arith.addf %187, %194 : vector<8x288xf32>
    %c0_194 = arith.constant 0 : index
    %c0_195 = arith.constant 0 : index
    %196 = vector.load %arg14[%c0_194, %c0_195] : memref<8x1xf32, #tpu.memory_space<vmem>>, vector<8x1xf32>
    %197 = vector.broadcast %196 : vector<8x1xf32> to vector<8x288xf32>
    %198 = arith.addf %195, %197 : vector<8x288xf32>
    %c0_196 = arith.constant 0 : index
    %c0_197 = arith.constant 0 : index
    %c0_198 = arith.constant 0 : index
    %199 = vector.load %arg15[%c0_196, %c0_197, %c0_198] : memref<1x8x288xf32, #tpu.memory_space<vmem>>, vector<1x8x288xf32>
    %200 = vector.shape_cast %199 : vector<1x8x288xf32> to vector<8x288xf32>
    %201 = vector.shape_cast %198 : vector<8x288xf32> to vector<1x8x288xf32>
    tpu.vector_store %arg15[%c0_196, %c0_197, %c0_198], %201 {strides = array<i32>} : memref<1x8x288xf32, #tpu.memory_space<vmem>>, vector<1x8x288xf32>,
    return
  }
  func.func @transform_0(%arg0: i32) -> (i32, i32) {
    %c0_i32 = arith.constant 0 : i32
    %c0_i32_0 = arith.constant 0 : i32
    %c0_i32_1 = arith.constant 0 : i32
    return %c0_i32, %c0_i32_0 : i32, i32
  }
  func.func @transform_1(%arg0: i32) -> (i32, i32, i32) {
    %c0_i32 = arith.constant 0 : i32
    %c0_i32_0 = arith.constant 0 : i32
    %c0_i32_1 = arith.constant 0 : i32
    return %arg0, %c0_i32, %c0_i32_0 : i32, i32, i32
  }
  func.func @transform_2(%arg0: i32) -> (i32, i32, i32) {
    %c0_i32 = arith.constant 0 : i32
    %c0_i32_0 = arith.constant 0 : i32
    %c0_i32_1 = arith.constant 0 : i32
    %c0_i32_2 = arith.constant 0 : i32
    return %c0_i32, %c0_i32_0, %c0_i32_1 : i32, i32, i32
  }
  func.func @transform_3(%arg0: i32) -> (i32, i32) {
    %c0_i32 = arith.constant 0 : i32
    %c0_i32_0 = arith.constant 0 : i32
    %c0_i32_1 = arith.constant 0 : i32
    return %c0_i32, %c0_i32_0 : i32, i32
  }
  func.func @transform_4(%arg0: i32) -> (i32, i32) {
    %c0_i32 = arith.constant 0 : i32
    %c0_i32_0 = arith.constant 0 : i32
    %c0_i32_1 = arith.constant 0 : i32
    return %c0_i32, %c0_i32_0 : i32, i32
  }
  func.func @transform_5(%arg0: i32) -> (i32, i32, i32) {
    %c0_i32 = arith.constant 0 : i32
    %c0_i32_0 = arith.constant 0 : i32
    %c0_i32_1 = arith.constant 0 : i32
    %c0_i32_2 = arith.constant 0 : i32
    return %c0_i32, %c0_i32_0, %c0_i32_1 : i32, i32, i32
  }
  func.func @transform_6(%arg0: i32) -> (i32, i32) {
    %c0_i32 = arith.constant 0 : i32
    %c0_i32_0 = arith.constant 0 : i32
    %c0_i32_1 = arith.constant 0 : i32
    return %c0_i32, %c0_i32_0 : i32, i32
  }
  func.func @transform_7(%arg0: i32) -> (i32, i32) {
    %c0_i32 = arith.constant 0 : i32
    %c0_i32_0 = arith.constant 0 : i32
    %c0_i32_1 = arith.constant 0 : i32
    return %c0_i32, %c0_i32_0 : i32, i32
  }
  func.func @transform_8(%arg0: i32) -> (i32, i32, i32) {
    %c0_i32 = arith.constant 0 : i32
    %c0_i32_0 = arith.constant 0 : i32
    %c0_i32_1 = arith.constant 0 : i32
    %c0_i32_2 = arith.constant 0 : i32
    return %c0_i32, %c0_i32_0, %c0_i32_1 : i32, i32, i32
  }
  func.func @transform_9(%arg0: i32) -> (i32, i32) {
    %c0_i32 = arith.constant 0 : i32
    %c0_i32_0 = arith.constant 0 : i32
    %c0_i32_1 = arith.constant 0 : i32
    return %c0_i32, %c0_i32_0 : i32, i32
  }
  func.func @transform_10(%arg0: i32) -> (i32, i32) {
    %c0_i32 = arith.constant 0 : i32
    %c0_i32_0 = arith.constant 0 : i32
    %c0_i32_1 = arith.constant 0 : i32
    return %c0_i32, %c0_i32_0 : i32, i32
  }
  func.func @transform_11(%arg0: i32) -> (i32, i32) {
    %c0_i32 = arith.constant 0 : i32
    %c0_i32_0 = arith.constant 0 : i32
    %c0_i32_1 = arith.constant 0 : i32
    return %c0_i32, %c0_i32_0 : i32, i32
  }
  func.func @transform_12(%arg0: i32) -> (i32, i32) {
    %c0_i32 = arith.constant 0 : i32
    %c0_i32_0 = arith.constant 0 : i32
    %c0_i32_1 = arith.constant 0 : i32
    return %c0_i32, %c0_i32_0 : i32, i32
  }
  func.func @transform_13(%arg0: i32) -> (i32, i32) {
    %c0_i32 = arith.constant 0 : i32
    %c0_i32_0 = arith.constant 0 : i32
    %c0_i32_1 = arith.constant 0 : i32
    return %c0_i32, %c0_i32_0 : i32, i32
  }
  func.func @transform_14(%arg0: i32) -> (i32, i32, i32) {
    %c0_i32 = arith.constant 0 : i32
    %c0_i32_0 = arith.constant 0 : i32
    %c0_i32_1 = arith.constant 0 : i32
    return %arg0, %c0_i32, %c0_i32_0 : i32, i32, i32
  }
}

</mosaic_0001>

<bundles_post_ra>
// kernel: tpu_custom_call.1
= control target key start
LH: loop header
LB: loop body
LE: loop exit
PB: predicated region body
PF: predicated region fallthrough
CT: control target
= control target key end

     0   :  { %s5288_s0 = inlined_call_operand.vmem [shape: f32[1,384], index: 0, kind: input, shape index: {}]   ;;  %s5289_s1 = inlined_call_operand.vmem [shape: bf16[2,4,384], index: 1, kind: input, shape index: {}]   ;;  %s5290_s2 = inlined_call_operand.vmem [shape: bf16[9,8,4], index: 2, kind: input, shape index: {}]   ;;  %s5291_s3 = inlined_call_operand.vmem [shape: f32[8,1], index: 3, kind: input, shape index: {}]   ;;  %s5292_s4 = inlined_call_operand.vmem [shape: f32[8,1], index: 4, kind: input, shape index: {}]   ;;  %s5293_s5 = inlined_call_operand.vmem [shape: bf16[9,8,8], index: 5, kind: input, shape index: {}]   ;;  %s5294_s6 = inlined_call_operand.vmem [shape: f32[8,1], index: 6, kind: input, shape index: {}]   ;;  %s5295_s7 = inlined_call_operand.vmem [shape: f32[8,1], index: 7, kind: input, shape index: {}]   ;;  %s5296_s8 = inlined_call_operand.vmem [shape: bf16[9,8,8], index: 8, kind: input, shape index: {}]   ;;  %s5297_s9 = inlined_call_operand.vmem [shape: f32[8,1], index: 9, kind: input, shape index: {}]   ;;  %s5298_s10 = inlined_call_operand.vmem [shape: f32[8,1], index: 10, kind: input, shape index: {}]   ;;  %s5299_s11 = inlined_call_operand.vmem [shape: bf16[8,4], index: 11, kind: input, shape index: {}]   ;;  %s5300_s12 = inlined_call_operand.vmem [shape: f32[8,1], index: 12, kind: input, shape index: {}]   ;;  %s5301_s13 = inlined_call_operand.vmem [shape: f32[8,1], index: 13, kind: input, shape index: {}]   ;;  %s5302_s14 = inlined_call_operand.hbm [shape: f32[2,8,288], index: 14, kind: output, shape index: {}]  }
   0x1   :  { %5324 = sst [smem:[#allocation8_spill]] %s5288_s0 }
   0x2   :  { %5325 = sst [smem:[#allocation9_spill]] %s5289_s1 }
   0x3   :  { %5326 = sst [smem:[#allocation10_spill]] %s5290_s2 }
   0x4   :  { %5327 = sst [smem:[#allocation11_spill]] %s5291_s3 }
   0x5   :  { %5328 = sst [smem:[#allocation12_spill]] %s5292_s4 }
   0x6   :  { %19 = vsyncpa [#allocation5], 0 }
   0x7   :  { %21 = vsyncpa [#allocation5 + $0x1], 0  ;;  %s4598_s29 = smov 0   ;;  %s4600_s30 = smov 0  }
   0x8   :  { %s4602_s15 = smov 0   ;;  %s4604_s16 = smov 0  }
   0x9 LB: > { %s4619_s17 = sadd.s32 4294967295, %s4507_s16   ;;  %s3827_s18 = sadd.s32 4294967294, %s4507_s16   ;;  %s4507_s16 = sphi %s4604_s16, %s5359_s16   ;;  %s4503_s15 = sphi %s4602_s15, %s5358_s15   ;;  %s4499_s30 = sphi %s4600_s30, %s5357_s30   ;;  %s4495_s29 = sphi %s4598_s29, %s5356_s29  }
   0xa   : > { %s4623_s19 = sadd.s32 1, %s4507_s16   ;;  %s333_s20 = sadd.s32 1, %s4503_s15 }
   0xb   : > { %s330_s21 = ssub.s32 %s4507_s16, %s4623_s19  ;;  %p343_p0 = scmp.ne.s32.totalorder %s4503_s15, %s4499_s30 }
   0xc   : > { %p331_p1 = scmp.eq.s32.totalorder %s330_s21, 0  ;;  %p344_p2 = scmp.eq.s32.totalorder %s4619_s17, 1 }
   0xd   : > { %p349_p3 = scmp.ne.s32.totalorder %s4499_s30, %s4495_s29  ;;  %p350_p4 = scmp.eq.s32.totalorder %s3827_s18, 1 }
   0xe   : > { %s4634_s22 = scalar_select %p331_p1, %s4503_s15, %s333_s20  }
   0xf   : > { %p4636_p5 = por %p344_p2, %p343_p0  ;;  %p4640_p6 = por %p350_p4, %p349_p3 }
  0x10   : > { %5329 = sst [smem:[#allocation7_spill]] %s4634_s22  ;;  %p3830_p7 = scmp.ge.s32.totalorder %s4507_s16, 1 }
  0x11   : > { %p415_p8 = scmp.lt.s32.totalorder %s4507_s16, 3 }
  0x13   : > { %p416_p9 = pnand %p3830_p7, %p415_p8 }
  0x14   : > { %p461_p10 = scmp.lt.s32.totalorder (!%p416_p9), %s4619_s17, 1  ;;  %v481_v0 = vlaneseq (!%p416_p9)  ;;  %v4509_v1 = vmov (!%p416_p9), 1983009808   ;;  %v4510_v3 = vmov (!%p416_p9), 0.0   ;;  %vm4511_vm0 = vmmov (!%p416_p9), 0   ;;  %s5332_s1 = sld [smem:[#allocation9_spill]] (!%p416_p9) }
  0x15   : > { %419 = sbr.rel (%p416_p9) target bundleno = 1641 (0x669), region = 76  ;;  %v479_v2 = vunpack.c.l.s4 (!%p416_p9), %v4509_v1  ;;  %4013 = vmatprep.subr.bf16.mxu1 (!%p416_p9), %v4510_v3  ;;  %4015 = vmatprep.mubr.msk.bf16.mxu1 (!%p416_p9), %vm4511_vm0, %v4510_v3  ;;  %v4512_v6 = vmov (!%p416_p9), 0   ;;  %s5313_s20 = smov (!%p416_p9), 127   ;;  %vm5322_vm1 = vcmask (!%p416_p9), 1041408   ;;  %vm499_vm2 = vcmask (!%p416_p9), 1039360  }
  0x16   : > { %v4649_v4 = vshrl.u32 (!%p416_p9), %v481_v0, 7  ;;  %548 = vmatprep.mubr.bf16.mxu0 (!%p416_p9), %v4512_v6  ;;  %468 = vst [vmem:[#allocation2] sm:$0xff] (!%p416_p9), %v4512_v6  ;;  %469 = vst [vmem:[#allocation2 + $0x8] sm:$0xf] (!%p416_p9), %v4512_v6  ;;  %4428 = vset.pattern.permute.xlu0 (!%p416_p9), %v4512_v6  ;;  %s5311_s21 = smov (!%p416_p9), 126   ;;  %s5305_s27 = smov (!%p416_p9), 108  }
  0x17   : > { %v480_v5 = vunpack.c.0.s8 (!%p416_p9), %v479_v2  ;;  %470 = vst [vmem:[#allocation3] sm:$0xff] (!%p416_p9), %v4512_v6  ;;  %471 = vst [vmem:[#allocation3 + $0x8] sm:$0xf] (!%p416_p9), %v4512_v6  ;;  %4429 = vset.pattern.permute.xlu1 (!%p416_p9), %v4512_v6  ;;  %s5307_s28 = smov (!%p416_p9), 92   ;;  %s5333_s3 = sld [smem:[#allocation11_spill]] (!%p416_p9)  ;;  %vm5319_vm3 = vcmask (!%p416_p9), 31744  }
  0x18   : > { %s5334_s4 = sld [smem:[#allocation12_spill]] (!%p416_p9)  ;;  %s5335_s2 = sld [smem:[#allocation10_spill]] (!%p416_p9)  ;;  %vm716_vm4 = vcmask (!%p416_p9), 1031168   ;;  %vm841_vm5 = vcmask (!%p416_p9), 900096   ;;  %vm966_vm6 = vcmask (!%p416_p9), 891904   ;;  %vm1091_vm7 = vcmask (!%p416_p9), 883712  }
  0x19   : > { %v4660_v7 = vsub.s32 (!%p416_p9), %v480_v5, %v4649_v4  ;;  %vm1216_vm8 = vcmask (!%p416_p9), 752640   ;;  %vm1341_vm9 = vcmask (!%p416_p9), 744448   ;;  %vm5323_vm10 = vcmask (!%p416_p9), 736256   ;;  %s5336_s0 = sld [smem:[#allocation8_spill]] (!%p416_p9) }
  0x1a   : > { %vm1632_vm14 = vcmask (!%p416_p9), 1043608   ;;  %vm1633_vm15 = vcmask (!%p416_p9), 1047556  }
  0x1c   : > { %s462_s25 = scalar_select %p461_p10, %s4619_s17, 1 }
  0x1d   : > { %v1565_v48 = vld [vmem:[%s5333_s3] sm:$0xff]  ;;  %s4522_s3 = smov [#allocation4]  }
  0x1e   : > { %s4374_s26 = smul.u32 6, %s462_s25  ;;  %s5309_s25 = smov 110   ;;  %v1574_v49 = vld [vmem:[%s5334_s4] sm:$0xff] }
  0x1f   : > { %v3832_v54 = vld [vmem:[%s5335_s2 + $0x4] sm:$0xf]  ;;  %v472_v1 = vld [vmem:[%s5335_s2] sm:$0xf]  ;;  %s5347_s4 = smov 19  }
  0x20   : > { %s4666_s18 = scalar_lea.vmem %s5332_s1, %s4374_s26  ;;  %s5303_s26 = smov 109  }
  0x21   : > { %v473_v8 = vld [vmem:[%s4666_s18] sm:$0x3f]  ;;  %s5346_s1 = smov 90  }
  0x22   : > { %v4670_v9 = vrot.slane %v473_v8, %v4660_v7  ;;  %v477_v10 = vcombine.high %v473_v8, %v473_v8  ;;  %v692_v11 = vld [vmem:[%s4666_s18] sm:$0x3f] }
  0x23   : > { %v701_v14 = vrot.slane %v692_v11, %v4660_v7  ;;  %v694_v15 = vcombine.high %v692_v11, %v692_v11  ;;  %v817_v17 = vld [vmem:[%s4666_s18] sm:$0x3f] }
  0x24   : > { %493 = vrot.lane.b32.xlu0 %v4670_v9, %s5313_s20  ;;  %v4676_v12 = vrot.slane %v477_v10, %v4660_v7  ;;  %v4680_v13 = vcombine.high %v4670_v9, %v4670_v9  ;;  %v826_v19 = vrot.slane %v817_v17, %v4660_v7  ;;  %v819_v20 = vcombine.high %v817_v17, %v817_v17  ;;  %v942_v22 = vld [vmem:[%s4666_s18] sm:$0x3f] }
  0x25   : > { %v709_v16 = vcombine.high %v701_v14, %v701_v14  ;;  %v708_v18 = vrot.slane %v694_v15, %v4660_v7  ;;  %v951_v24 = vrot.slane %v942_v22, %v4660_v7  ;;  %v944_v25 = vcombine.high %v942_v22, %v942_v22  ;;  %v1067_v27 = vld [vmem:[%s4666_s18] sm:$0x3f] }
  0x26   : > { %497 = vrot.lane.b32.xlu1 %v4676_v12, %s5313_s20  ;;  %v834_v21 = vcombine.high %v826_v19, %v826_v19  ;;  %v833_v23 = vrot.slane %v819_v20, %v4660_v7  ;;  %v1076_v29 = vrot.slane %v1067_v27, %v4660_v7  ;;  %v1069_v30 = vcombine.high %v1067_v27, %v1067_v27  ;;  %v1192_v32 = vld [vmem:[%s4666_s18] sm:$0x3f] }
  0x27   : > { %v959_v26 = vcombine.high %v951_v24, %v951_v24  ;;  %v958_v28 = vrot.slane %v944_v25, %v4660_v7  ;;  %v1201_v34 = vrot.slane %v1192_v32, %v4660_v7  ;;  %v1194_v35 = vcombine.high %v1192_v32, %v1192_v32  ;;  %v1317_v37 = vld [vmem:[%s4666_s18] sm:$0x3f] }
  0x28   : > { %495 = vrot.lane.b32.xlu0 %v4680_v13, %s5313_s20  ;;  %v1084_v31 = vcombine.high %v1076_v29, %v1076_v29  ;;  %v1083_v33 = vrot.slane %v1069_v30, %v4660_v7  ;;  %v1326_v39 = vrot.slane %v1317_v37, %v4660_v7  ;;  %v1319_v40 = vcombine.high %v1317_v37, %v1317_v37  ;;  %v1442_v42 = vld [vmem:[%s4666_s18] sm:$0x3f]  ;;  %v3851_v37 = vld [vmem:[%s5335_s2 + $0x14] sm:$0xf]  ;;  %s5320_s20 = smov 19  }
  0x29   : > { %v1209_v36 = vcombine.high %v1201_v34, %v1201_v34  ;;  %v1208_v38 = vrot.slane %v1194_v35, %v4660_v7  ;;  %v1451_v44 = vrot.slane %v1442_v42, %v4660_v7  ;;  %v1444_v45 = vcombine.high %v1442_v42, %v1442_v42 }
  0x2a   : > { %710 = vrot.lane.b32.xlu1 %v701_v14, %s5311_s21  ;;  %v1334_v41 = vcombine.high %v1326_v39, %v1326_v39  ;;  %v1333_v43 = vrot.slane %v1319_v40, %v4660_v7  ;;  %v607_v57 = vsel %vm5322_vm1, %v4676_v12, 0  ;;  %v601_v60 = vsel %vm5322_vm1, %v4670_v9, 0 }
  0x2b   : > { %v1459_v46 = vcombine.high %v1451_v44, %v1451_v44  ;;  %v1458_v47 = vrot.slane %v1444_v45, %v4660_v7  ;;  %v3855_v45 = vld [vmem:[%s5335_s2 + $0x18] sm:$0xf] }
  0x2c   : > { %712 = vrot.lane.b32.xlu0 %v709_v16, %s5311_s21 }
  0x2e   : > { %714 = vrot.lane.b32.xlu1 %v708_v18, %s5311_s21  ;;  %s5339_s21 = smov 127  }
  0x30   : > { %835 = vrot.lane.b32.xlu0 %v826_v19, %s5309_s25 }
  0x32   : > { %837 = vrot.lane.b32.xlu1 %v834_v21, %s5309_s25  ;;  %v3843_v21 = vld [vmem:[%s5335_s2 + $0xc] sm:$0xf] }
  0x34   : > { %839 = vrot.lane.b32.xlu0 %v833_v23, %s5309_s25  ;;  %s5340_s25 = smov 126  }
  0x36   : > { %960 = vrot.lane.b32.xlu1 %v951_v24, %s5303_s26 }
  0x38   : > { %962 = vrot.lane.b32.xlu0 %v959_v26, %s5303_s26 }
  0x3a   : > { %964 = vrot.lane.b32.xlu1 %v958_v28, %s5303_s26  ;;  %s5315_s26 = smov 91  }
  0x3c   : > { %1085 = vrot.lane.b32.xlu0 %v1076_v29, %s5305_s27  ;;  %v3847_v29 = vld [vmem:[%s5335_s2 + $0x10] sm:$0xf] }
  0x3e   : > { %1087 = vrot.lane.b32.xlu1 %v1084_v31, %s5305_s27 }
  0x40   : > { %1089 = vrot.lane.b32.xlu0 %v1083_v33, %s5305_s27  ;;  %s5317_s27 = smov 90  }
  0x42   : > { %1210 = vrot.lane.b32.xlu1 %v1201_v34, %s5307_s28 }
  0x44   : > { %1212 = vrot.lane.b32.xlu0 %v1209_v36, %s5307_s28 }
  0x46   : > { %1214 = vrot.lane.b32.xlu1 %v1208_v38, %s5307_s28  ;;  %s5343_s28 = smov 108  }
  0x48   : > { %1335 = vrot.lane.b32.xlu0 %v1326_v39, %s5315_s26 }
  0x4a   : > { %1337 = vrot.lane.b32.xlu1 %v1334_v41, %s5315_s26 }
  0x4c   : > { %1339 = vrot.lane.b32.xlu0 %v1333_v43, %s5315_s26  ;;  %s5341_s26 = smov 110  }
  0x4e   : > { %1460 = vrot.lane.b32.xlu1 %v1451_v44, %s5317_s27 }
  0x50   : > { %1462 = vrot.lane.b32.xlu0 %v1459_v46, %s5317_s27 }
  0x52   : > { %1464 = vrot.lane.b32.xlu1 %v1458_v47, %s5317_s27  ;;  %s5342_s27 = smov 109  }
  0x54   : > { %1568 = vperm.xlu0 %4428, %v1565_v48  }
  0x56   : > { %1577 = vperm.xlu1 %4429, %v1574_v49  }
  0x96   : > { %v494_v50 = vpop.permute.xlu0 %493 }
  0x98   : > { %v498_v51 = vpop.permute.xlu1 %497 }
  0x99   : > { %v514_v52 = vsel %vm5322_vm1, %v498_v51, 0 }
  0x9a   : > { %v496_v53 = vpop.permute.xlu0 %495  ;;  %4014 = vmatpush3.bf16.msra.mxu1 %v514_v52  ;;  %v3859_v52 = vld [vmem:[%s5335_s2 + $0x1c] sm:$0xf] }
  0x9b   : > { %v501_v55 = vsel %vm499_vm2, %v496_v53, %v498_v51  ;;  %v500_v56 = vsel %vm499_vm2, %v494_v50, %v496_v53  ;;  %4019 = vmatprep.subr.bf16.mxu1 %v4510_v3 }
  0x9c   : > { %3833 = vmatprep.subr.msk.bf16.mxu0 %vm5322_vm1, %v501_v55  ;;  %v508_v58 = vsel %vm5322_vm1, %v500_v56, 0  ;;  %v711_v59 = vpop.permute.xlu1 %710  ;;  %v3863_v56 = vld [vmem:[%s5335_s2 + $0x20] sm:$0xf] }
  0x9d   : > { %517 = vmatpush1.bf16.msra.mxu0 %v508_v58  ;;  %4016 = vmatmul.mubr.msk.bf16.vlgmr.msra.gmra.mrb[0].mxu1 %vm5319_vm3, %v3832_v54 }
  0x9e   : > { %3836 = vmatprep.subr.msk.bf16.mxu0 %vm5322_vm1, %v4680_v13  ;;  %4020 = vmatpush3.bf16.msra.mxu1 %v607_v57  ;;  %v713_v61 = vpop.permute.xlu0 %712  ;;  %v3839_v13 = vld [vmem:[%s5335_s2 + $0x8] sm:$0xf] }
  0x9f   : > { %4021 = vmatprep.mubr.msk.bf16.mxu1 %vm4511_vm0, %v4510_v3  ;;  %4025 = vmatprep.subr.bf16.mxu1 %v4510_v3  ;;  %v717_v2 = vsel %vm716_vm4, %v711_v59, %v713_v61 }
  0xa0   : > { %3834 = vmatmul.mubr.msk.bf16.vlgmr.msra.gmra.mrb[0].mxu0 %vm5319_vm3, %v3832_v54  ;;  %v715_v62 = vpop.permute.xlu1 %714  ;;  %v723_v10 = vsel %vm5322_vm1, %v717_v2, 0 }
  0xa1   : > { %610 = vmatpush1.bf16.msra.mxu0 %v601_v60  ;;  %v718_v63 = vsel %vm716_vm4, %v713_v61, %v715_v62  ;;  %641 = vmatprep.mubr.bf16.mxu0 %v4512_v6  ;;  %v729_v5 = vsel %vm5322_vm1, %v715_v62, 0  ;;  %v1603_v60 = vsub.s32 2, %v4649_v4 }
  0xa2   : > { %3840 = vmatprep.subr.msk.bf16.mxu0 %vm5322_vm1, %v718_v63  ;;  %v836_v0 = vpop.permute.xlu0 %835  ;;  %v467_v63 = vld [vmem:[%s5336_s0] sm:$0x7]  ;;  %s5345_s0 = smov 91  }
  0xa4   : > { %v838_v9 = vpop.permute.xlu1 %837 }
  0xa5   : > { %v842_v15 = vsel %vm841_vm5, %v836_v0, %v838_v9 }
  0xa6   : > { %v840_v8 = vpop.permute.xlu0 %839  ;;  %v848_v18 = vsel %vm5322_vm1, %v842_v15, 0 }
  0xa7   : > { %v843_v11 = vsel %vm841_vm5, %v838_v9, %v840_v8  ;;  %v854_v14 = vsel %vm5322_vm1, %v840_v8, 0  ;;  %v1595_v8 = vsub.s32 0, %v4649_v4 }
  0xa8   : > { %v961_v12 = vpop.permute.xlu1 %960 }
  0xa9   : > { %4022 = vmatmul.mubr.msk.bf16.vlgmr.msra.gmra.mrb[0].mxu1 %vm5319_vm3, %v472_v1 }
  0xaa   : > { %4026 = vmatpush3.bf16.msra.mxu1 %v729_v5  ;;  %4027 = vmatprep.mubr.msk.bf16.mxu1 %vm4511_vm0, %v4510_v3  ;;  %v963_v16 = vpop.permute.xlu0 %962 }
  0xab   : > { %4031 = vmatprep.subr.bf16.mxu1 %v4510_v3  ;;  %v967_v22 = vsel %vm966_vm6, %v961_v12, %v963_v16  ;;  %v1599_v12 = vsub.s32 1, %v4649_v4 }
  0xac   : > { %3837 = vmatmul.mubr.msk.bf16.vlgmr.msra.gmra.mrb[0].mxu0 %vm5319_vm3, %v472_v1  ;;  %v965_v17 = vpop.permute.xlu1 %964  ;;  %v973_v26 = vsel %vm5322_vm1, %v967_v22, 0 }
  0xad   : > { %732 = vmatpush1.bf16.msra.mxu0 %v723_v10  ;;  %763 = vmatprep.mubr.bf16.mxu0 %v4512_v6  ;;  %v968_v19 = vsel %vm966_vm6, %v963_v16, %v965_v17  ;;  %v979_v23 = vsel %vm5322_vm1, %v965_v17, 0 }
  0xae   : > { %3844 = vmatprep.subr.msk.bf16.mxu0 %vm5322_vm1, %v843_v11  ;;  %v1086_v20 = vpop.permute.xlu0 %1085  ;;  %v4865_v11 = vrot.slane %v467_v63, %v1603_v60 }
  0xb0   : > { %v1088_v25 = vpop.permute.xlu1 %1087 }
  0xb1   : > { %v1092_v31 = vsel %vm1091_vm7, %v1086_v20, %v1088_v25  ;;  %v4868_v20 = vrot.slane %v467_v63, %v1595_v8 }
  0xb2   : > { %v1090_v24 = vpop.permute.xlu0 %1089  ;;  %v1098_v34 = vsel %vm5322_vm1, %v1092_v31, 0  ;;  %v3608_v31 = vld [vmem:[%s4666_s18] sm:$0x3f] }
  0xb3   : > { %v1093_v27 = vsel %vm1091_vm7, %v1088_v25, %v1090_v24  ;;  %v1104_v30 = vsel %vm5322_vm1, %v1090_v24, 0 }
  0xb4   : > { %v1211_v28 = vpop.permute.xlu1 %1210 }
  0xb5   : > { %4028 = vmatmul.mubr.msk.bf16.vlgmr.msra.gmra.mrb[0].mxu1 %vm5319_vm3, %v3839_v13 }
  0xb6   : > { %4032 = vmatpush3.bf16.msra.mxu1 %v854_v14  ;;  %4033 = vmatprep.mubr.msk.bf16.mxu1 %vm4511_vm0, %v4510_v3  ;;  %v1213_v32 = vpop.permute.xlu0 %1212 }
  0xb7   : > { %4037 = vmatprep.subr.bf16.mxu1 %v4510_v3  ;;  %v1217_v38 = vsel %vm1216_vm8, %v1211_v28, %v1213_v32 }
  0xb8   : > { %3841 = vmatmul.mubr.msk.bf16.vlgmr.msra.gmra.mrb[0].mxu0 %vm5319_vm3, %v3839_v13  ;;  %v1215_v33 = vpop.permute.xlu1 %1214  ;;  %v1223_v42 = vsel %vm5322_vm1, %v1217_v38, 0 }
  0xb9   : > { %857 = vmatpush1.bf16.msra.mxu0 %v848_v18  ;;  %888 = vmatprep.mubr.bf16.mxu0 %v4512_v6  ;;  %v1218_v35 = vsel %vm1216_vm8, %v1213_v32, %v1215_v33  ;;  %v1229_v39 = vsel %vm5322_vm1, %v1215_v33, 0 }
  0xba   : > { %3848 = vmatprep.subr.msk.bf16.mxu0 %vm5322_vm1, %v968_v19  ;;  %v1336_v36 = vpop.permute.xlu0 %1335 }
  0xbc   : > { %v1338_v41 = vpop.permute.xlu1 %1337 }
  0xbd   : > { %v1342_v47 = vsel %vm1341_vm9, %v1336_v36, %v1338_v41 }
  0xbe   : > { %v1340_v40 = vpop.permute.xlu0 %1339  ;;  %v1348_v50 = vsel %vm5322_vm1, %v1342_v47, 0 }
  0xbf   : > { %v1343_v43 = vsel %vm1341_vm9, %v1338_v41, %v1340_v40  ;;  %v1354_v46 = vsel %vm5322_vm1, %v1340_v40, 0  ;;  %v2598_v40 = vld [vmem:[%s5295_s7] sm:$0xff] }
  0xc0   : > { %v1461_v44 = vpop.permute.xlu1 %1460  ;;  %v2589_v41 = vld [vmem:[%s5294_s6] sm:$0xff] }
  0xc1   : > { %4034 = vmatmul.mubr.msk.bf16.vlgmr.msra.gmra.mrb[0].mxu1 %vm5319_vm3, %v3843_v21 }
  0xc2   : > { %4038 = vmatpush3.bf16.msra.mxu1 %v979_v23  ;;  %4039 = vmatprep.mubr.msk.bf16.mxu1 %vm4511_vm0, %v4510_v3  ;;  %v1463_v48 = vpop.permute.xlu0 %1462  ;;  %v4871_v23 = vrot.slane %v467_v63, %v1599_v12 }
  0xc3   : > { %4043 = vmatprep.subr.bf16.mxu1 %v4510_v3  ;;  %v1467_v53 = vsel %vm5323_vm10, %v1461_v44, %v1463_v48 }
  0xc4   : > { %3845 = vmatmul.mubr.msk.bf16.vlgmr.msra.gmra.mrb[0].mxu0 %vm5319_vm3, %v3843_v21  ;;  %v1465_v49 = vpop.permute.xlu1 %1464  ;;  %v1473_v55 = vsel %vm5322_vm1, %v1467_v53, 0 }
  0xc5   : > { %982 = vmatpush1.bf16.msra.mxu0 %v973_v26  ;;  %1013 = vmatprep.mubr.bf16.mxu0 %v4512_v6  ;;  %v1468_v51 = vsel %vm5323_vm10, %v1463_v48, %v1465_v49  ;;  %v1479_v54 = vsel %vm5322_vm1, %v1465_v49, 0 }
  0xc6   : > { %3852 = vmatprep.subr.msk.bf16.mxu0 %vm5322_vm1, %v1093_v27 }
  0xcd   : > { %4040 = vmatmul.mubr.msk.bf16.vlgmr.msra.gmra.mrb[0].mxu1 %vm5319_vm3, %v3847_v29 }
  0xce   : > { %4044 = vmatpush3.bf16.msra.mxu1 %v1104_v30  ;;  %4045 = vmatprep.mubr.msk.bf16.mxu1 %vm4511_vm0, %v4510_v3 }
  0xcf   : > { %4049 = vmatprep.subr.bf16.mxu1 %v4510_v3 }
  0xd0   : > { %3849 = vmatmul.mubr.msk.bf16.vlgmr.msra.gmra.mrb[0].mxu0 %vm5319_vm3, %v3847_v29 }
  0xd1   : > { %1107 = vmatpush1.bf16.msra.mxu0 %v1098_v34  ;;  %1138 = vmatprep.mubr.bf16.mxu0 %v4512_v6 }
  0xd2   : > { %3856 = vmatprep.subr.msk.bf16.mxu0 %vm5322_vm1, %v1218_v35 }
  0xd3   : > { %v1569_v57 = vpop.permute.xlu0 %1568 }
  0xd5   : > { %v1578_v59 = vpop.permute.xlu1 %1577 }
  0xd9   : > { %4046 = vmatmul.mubr.msk.bf16.vlgmr.msra.gmra.mrb[0].mxu1 %vm5319_vm3, %v3851_v37 }
  0xda   : > { %4050 = vmatpush3.bf16.msra.mxu1 %v1229_v39  ;;  %4051 = vmatprep.mubr.msk.bf16.mxu1 %vm4511_vm0, %v4510_v3 }
  0xdb   : > { %4055 = vmatprep.subr.bf16.mxu1 %v4510_v3 }
  0xdc   : > { %3853 = vmatmul.mubr.msk.bf16.vlgmr.msra.gmra.mrb[0].mxu0 %vm5319_vm3, %v3851_v37 }
  0xdd   : > { %1232 = vmatpush1.bf16.msra.mxu0 %v1223_v42  ;;  %1263 = vmatprep.mubr.bf16.mxu0 %v4512_v6 }
  0xde   : > { %3860 = vmatprep.subr.msk.bf16.mxu0 %vm5322_vm1, %v1343_v43 }
  0xe5   : > { %4052 = vmatmul.mubr.msk.bf16.vlgmr.msra.gmra.mrb[0].mxu1 %vm5319_vm3, %v3855_v45 }
  0xe6   : > { %4056 = vmatpush3.bf16.msra.mxu1 %v1354_v46  ;;  %4057 = vmatprep.mubr.msk.bf16.mxu1 %vm4511_vm0, %v4510_v3 }
  0xe7   : > { %4061 = vmatprep.subr.bf16.mxu1 %v4510_v3 }
  0xe8   : > { %3857 = vmatmul.mubr.msk.bf16.vlgmr.msra.gmra.mrb[0].mxu0 %vm5319_vm3, %v3855_v45 }
  0xe9   : > { %1357 = vmatpush1.bf16.msra.mxu0 %v1348_v50  ;;  %1388 = vmatprep.mubr.bf16.mxu0 %v4512_v6  ;;  %v3869_v50 = vld [vmem:[%s5293_s5 + $0x4] sm:$0xf] }
  0xea   : > { %3864 = vmatprep.subr.msk.bf16.mxu0 %vm5322_vm1, %v1468_v51 }
  0xf1   : > { %4058 = vmatmul.mubr.msk.bf16.vlgmr.msra.gmra.mrb[0].mxu1 %vm5319_vm3, %v3859_v52 }
  0xf2   : > { %4062 = vmatpush3.bf16.msra.mxu1 %v1479_v54  ;;  %4063 = vmatprep.mubr.msk.bf16.mxu1 %vm4511_vm0, %v4510_v3 }
  0xf3   : > { %4067 = vmatprep.subr.bf16.mxu1 %v4510_v3 }
  0xf4   : > { %3861 = vmatmul.mubr.msk.bf16.vlgmr.msra.gmra.mrb[0].mxu0 %vm5319_vm3, %v3859_v52 }
  0xf5   : > { %1482 = vmatpush1.bf16.msra.mxu0 %v1473_v55  ;;  %1513 = vmatprep.mubr.bf16.mxu0 %v4512_v6 }
  0xfd   : > { %4064 = vmatmul.mubr.msk.bf16.vlgmr.msra.gmra.mrb[0].mxu1 %vm5319_vm3, %v3863_v56 }
  0xfe   : > { %4069 = vmatprep.mubr.msk.bf16.mxu1 %vm4511_vm0, %v4510_v3 }
 0x100   : > { %3865 = vmatmul.mubr.msk.bf16.vlgmr.msra.gmra.mrb[0].mxu0 %vm5319_vm3, %v3863_v56  ;;  %vm4877_vm3 = vmor %vm1633_vm15, %vm1632_vm14  ;;  %vm1659_vm14 = vcmask 64512  }
 0x101   : > { %1705 = vmatprep.mubr.bf16.mxu0 %v4512_v6 }
 0x1d0   : > { %v1556_v58 = vpop.f32.mrb[0].mxu1 }
 0x1d1   : > { %v1573_v61 = vmul.f32 %v1569_v57, %v1556_v58  ;;  %v4065_v62 = vpop.f32.mrb[1].mxu1 }
 0x1d2   : > { %v1559_v0 = vpop.f32.mrb[2].mxu1 }
 0x1d3   : > { %v1582_v1 = vadd.f32 %v1578_v59, %v1573_v61  ;;  %v1515_v2 = vpop.f32.mrb[0].mxu0  ;;  %v4066_v5 = vpop.f32.mrb[3].mxu1 }
 0x1d4   : > { %v1571_v9 = vmul.f32 %v1569_v57, %v1515_v2  ;;  %v1517_v10 = vpop.f32.mrb[1].mxu0 }
 0x1d5   : > { %v1588_v13 = vmul.f32 0.1, %v1582_v1  ;;  %v1572_v14 = vmul.f32 %v1569_v57, %v1517_v10  ;;  %v1519_v15 = vpop.f32.mrb[2].mxu0  ;;  %vm1585_vm11 = vcmp.gt.f32.partialorder %v1582_v1, 0.0  ;;  %v1638_v57 = vld [vmem:[%s5293_s5] sm:$0xf] }
 0x1d6   : > { %v1580_v16 = vadd.f32 %v1578_v59, %v1571_v9  ;;  %v1520_v17 = vpop.f32.mrb[3].mxu0 }
 0x1d7   : > { %v1581_v18 = vadd.f32 %v1578_v59, %v1572_v14  ;;  %v1591_v19 = vsel %vm1585_vm11, %v1582_v1, %v1588_v13  ;;  %vm1627_vm11 = vcmask 154624   ;;  %v3879_v1 = vld [vmem:[%s5293_s5 + $0x8] sm:$0xf]  ;;  %v3883_v14 = vld [vmem:[%s5293_s5 + $0xc] sm:$0xf] }
 0x1d8   : > { %vm1583_vm12 = vcmp.gt.f32.partialorder %v1580_v16, 0.0  ;;  %v1586_v21 = vmul.f32 0.1, %v1580_v16  ;;  %v1610_v22 = vmul.f32 %v4865_v11, %v1591_v19 }
 0x1d9   : > { %vm1584_vm13 = vcmp.gt.f32.partialorder %v1581_v18, 0.0  ;;  %v1587_v24 = vmul.f32 0.1, %v1581_v18 }
 0x1da   : > { %v3954_v25 = vpack.c.bf16 %v1610_v22, %v1610_v22  ;;  %v1589_v4 = vsel %vm1583_vm12, %v1580_v16, %v1586_v21  ;;  %vm1636_vm12 = vcmask 412672  }
 0x1db   : > { %v1590_v26 = vsel %vm1584_vm13, %v1581_v18, %v1587_v24  ;;  %v1608_v27 = vmul.f32 %v4868_v20, %v1589_v4  ;;  %vm1663_vm13 = vcmask 1043456   ;;  %v3887_v24 = vld [vmem:[%s5293_s5 + $0x10] sm:$0xf] }
 0x1dc   : > { %1624 = vrot.lane.b32.xlu0 %v3954_v25, %s5320_s20  ;;  %v1609_v28 = vmul.f32 %v4871_v23, %v1590_v26 }
 0x1de   : > { %v3953_v29 = vpack.c.bf16 %v1609_v28, %v1608_v27 }
 0x1e0   : > { %1622 = vrot.lane.b32.xlu1 %v3953_v29, %s5320_s20  ;;  %s5344_s20 = smov 92  }
 0x24e   : > { %v1625_v33 = vpop.permute.xlu0 %1624 }
 0x252   : > { %v1623_v30 = vpop.permute.xlu1 %1622 }
 0x253   : > { %v1626_v32 = vrot.slane %v1623_v30, 4 }
 0x255   : > { %v1628_v34 = vsel %vm1627_vm11, %v1626_v32, %v1623_v30  ;;  %v1629_v35 = vsel %vm1627_vm11, %v1626_v32, %v1625_v33  ;;  %v3891_v32 = vld [vmem:[%s5293_s5 + $0x14] sm:$0xf] }
 0x256   : > { %1635 = vst.msk [vmem:[#allocation2] sm:$0xff] %vm4877_vm3, %v1628_v34 }
 0x257   : > { %1637 = vst.msk [vmem:[#allocation2 + $0x8] sm:$0xf] %vm1636_vm12, %v1629_v35 }
 0x25d   : > { %v1639_v36 = vld [vmem:[#allocation2] sm:$0xff] }
 0x25e   : > { %v3870_v37 = vcombine.low %v1639_v36, %v1639_v36  ;;  %v3871_v38 = vcombine.high %v1639_v36, %v1639_v36  ;;  %v4440_v39 = vld [vmem:[#allocation2 + $0x8] ss:$0 sps:$4 sm:$0xff]  }
 0x25f   : > { %v1764_v53 = vsel %vm1663_vm13, %v4440_v39, 0 }
 0x260   : > { %1651 = vrot.lane.b32.xlu1 %v3870_v37, %s5339_s21  ;;  %1653 = vrot.lane.b32.xlu0 %v3871_v38, %s5339_s21  ;;  %v1758_v54 = vsel %vm1663_vm13, %v3870_v37, 0 }
 0x264   : > { %1849 = vrot.lane.b32.xlu0 %v3870_v37, %s5340_s25  ;;  %1655 = vrot.lane.b32.xlu1 %v4440_v39, %s5339_s21 }
 0x268   : > { %1853 = vrot.lane.b32.xlu0 %v4440_v39, %s5340_s25  ;;  %1851 = vrot.lane.b32.xlu1 %v3871_v38, %s5340_s25 }
 0x26c   : > { %1957 = vrot.lane.b32.xlu0 %v3871_v38, %s5341_s26  ;;  %1955 = vrot.lane.b32.xlu1 %v3870_v37, %s5341_s26 }
 0x270   : > { %2061 = vrot.lane.b32.xlu0 %v3870_v37, %s5342_s27  ;;  %1959 = vrot.lane.b32.xlu1 %v4440_v39, %s5341_s26 }
 0x274   : > { %2065 = vrot.lane.b32.xlu0 %v4440_v39, %s5342_s27  ;;  %2063 = vrot.lane.b32.xlu1 %v3871_v38, %s5342_s27 }
 0x278   : > { %2169 = vrot.lane.b32.xlu0 %v3871_v38, %s5343_s28  ;;  %2167 = vrot.lane.b32.xlu1 %v3870_v37, %s5343_s28 }
 0x27c   : > { %2273 = vrot.lane.b32.xlu0 %v3870_v37, %s5344_s20  ;;  %2171 = vrot.lane.b32.xlu1 %v4440_v39, %s5343_s28 }
 0x280   : > { %2277 = vrot.lane.b32.xlu0 %v4440_v39, %s5344_s20  ;;  %2275 = vrot.lane.b32.xlu1 %v3871_v38, %s5344_s20 }
 0x284   : > { %2381 = vrot.lane.b32.xlu0 %v3871_v38, %s5345_s0  ;;  %2379 = vrot.lane.b32.xlu1 %v3870_v37, %s5345_s0 }
 0x288   : > { %2485 = vrot.lane.b32.xlu0 %v3870_v37, %s5346_s1  ;;  %2383 = vrot.lane.b32.xlu1 %v4440_v39, %s5345_s0 }
 0x28c   : > { %2489 = vrot.lane.b32.xlu0 %v4440_v39, %s5346_s1  ;;  %2487 = vrot.lane.b32.xlu1 %v3871_v38, %s5346_s1 }
 0x290   : > { %2601 = vperm.xlu0 %4428, %v2598_v40   ;;  %2592 = vperm.xlu1 %4429, %v2589_v41   ;;  %v3895_v40 = vld [vmem:[%s5293_s5 + $0x18] sm:$0xf] }
 0x2d2   : > { %v1652_v42 = vpop.permute.xlu1 %1651  ;;  %v1654_v43 = vpop.permute.xlu0 %1653 }
 0x2d3   : > { %v1657_v44 = vsel %vm499_vm2, %v1652_v42, %v1654_v43 }
 0x2d4   : > { %v1665_v49 = vsel %vm1663_vm13, %v1657_v44, 0 }
 0x2d6   : > { %v1656_v45 = vpop.permute.xlu1 %1655  ;;  %v1850_v46 = vpop.permute.xlu0 %1849 }
 0x2d7   : > { %v1658_v47 = vsel %vm499_vm2, %v1654_v43, %v1656_v45  ;;  %v1671_v48 = vsel %vm1663_vm13, %v1656_v45, 0 }
 0x2d8   : > { %3873 = vmatprep.subr.msk.bf16.mxu0 %vm1663_vm13, %v1658_v47  ;;  %4068 = vmatpush3.bf16.msra.mxu1 %v1671_v48  ;;  %v3899_v47 = vld [vmem:[%s5293_s5 + $0x1c] sm:$0xf] }
 0x2d9   : > { %1674 = vmatpush1.bf16.msra.mxu0 %v1665_v49  ;;  %4073 = vmatprep.subr.bf16.mxu1 %v4510_v3 }
 0x2da   : > { %v1852_v51 = vpop.permute.xlu1 %1851  ;;  %3876 = vmatprep.subr.msk.bf16.mxu0 %vm1663_vm13, %v3871_v38  ;;  %v1854_v52 = vpop.permute.xlu0 %1853 }
 0x2db   : > { %4070 = vmatmul.mubr.msk.bf16.vlgmr.msra.gmra.mrb[4].mxu1 %vm1659_vm14, %v3869_v50  ;;  %v1856_v55 = vsel %vm716_vm4, %v1852_v51, %v1854_v52  ;;  %v1855_v58 = vsel %vm716_vm4, %v1850_v46, %v1852_v51  ;;  %v1867_v61 = vsel %vm1663_vm13, %v1854_v52, 0  ;;  %v3903_v51 = vld [vmem:[%s5293_s5 + $0x20] sm:$0xf] }
 0x2dc   : > { %3874 = vmatmul.mubr.msk.bf16.vlgmr.msra.gmra.mrb[4].mxu0 %vm1659_vm14, %v3869_v50  ;;  %4074 = vmatpush3.bf16.msra.mxu1 %v1764_v53  ;;  %v1861_v62 = vsel %vm1663_vm13, %v1855_v58, 0 }
 0x2dd   : > { %1767 = vmatpush1.bf16.msra.mxu0 %v1758_v54  ;;  %4075 = vmatprep.mubr.msk.bf16.mxu1 %vm4511_vm0, %v4510_v3 }
 0x2de   : > { %3880 = vmatprep.subr.msk.bf16.mxu0 %vm1663_vm13, %v1856_v55  ;;  %4079 = vmatprep.subr.bf16.mxu1 %v4510_v3  ;;  %v1956_v56 = vpop.permute.xlu1 %1955  ;;  %v1958_v59 = vpop.permute.xlu0 %1957 }
 0x2df   : > { %1798 = vmatprep.mubr.bf16.mxu0 %v4512_v6  ;;  %v1961_v2 = vsel %vm841_vm5, %v1956_v56, %v1958_v59 }
 0x2e0   : > { %v1967_v10 = vsel %vm1663_vm13, %v1961_v2, 0 }
 0x2e2   : > { %v1960_v60 = vpop.permute.xlu1 %1959  ;;  %v2062_v0 = vpop.permute.xlu0 %2061 }
 0x2e3   : > { %v1962_v63 = vsel %vm841_vm5, %v1958_v59, %v1960_v60  ;;  %v1973_v9 = vsel %vm1663_vm13, %v1960_v60, 0 }
 0x2e6   : > { %v2064_v5 = vpop.permute.xlu1 %2063  ;;  %v2066_v8 = vpop.permute.xlu0 %2065 }
 0x2e7   : > { %4076 = vmatmul.mubr.msk.bf16.vlgmr.msra.gmra.mrb[4].mxu1 %vm1659_vm14, %v1638_v57  ;;  %v2068_v12 = vsel %vm966_vm6, %v2064_v5, %v2066_v8  ;;  %v2067_v15 = vsel %vm966_vm6, %v2062_v0, %v2064_v5  ;;  %v2079_v18 = vsel %vm1663_vm13, %v2066_v8, 0 }
 0x2e8   : > { %4080 = vmatpush3.bf16.msra.mxu1 %v1867_v61  ;;  %3877 = vmatmul.mubr.msk.bf16.vlgmr.msra.gmra.mrb[4].mxu0 %vm1659_vm14, %v1638_v57  ;;  %v2073_v19 = vsel %vm1663_vm13, %v2067_v15, 0 }
 0x2e9   : > { %1870 = vmatpush1.bf16.msra.mxu0 %v1861_v62  ;;  %4081 = vmatprep.mubr.msk.bf16.mxu1 %vm4511_vm0, %v4510_v3 }
 0x2ea   : > { %3884 = vmatprep.subr.msk.bf16.mxu0 %vm1663_vm13, %v1962_v63  ;;  %4085 = vmatprep.subr.bf16.mxu1 %v4510_v3  ;;  %v2168_v13 = vpop.permute.xlu1 %2167  ;;  %v2170_v16 = vpop.permute.xlu0 %2169 }
 0x2eb   : > { %1901 = vmatprep.mubr.bf16.mxu0 %v4512_v6  ;;  %v2173_v25 = vsel %vm1091_vm7, %v2168_v13, %v2170_v16 }
 0x2ec   : > { %v2179_v28 = vsel %vm1663_vm13, %v2173_v25, 0 }
 0x2ee   : > { %v2172_v17 = vpop.permute.xlu1 %2171  ;;  %v2274_v22 = vpop.permute.xlu0 %2273 }
 0x2ef   : > { %v2174_v21 = vsel %vm1091_vm7, %v2170_v16, %v2172_v17  ;;  %v2185_v27 = vsel %vm1663_vm13, %v2172_v17, 0 }
 0x2f2   : > { %v2276_v4 = vpop.permute.xlu1 %2275  ;;  %v2278_v26 = vpop.permute.xlu0 %2277 }
 0x2f3   : > { %4082 = vmatmul.mubr.msk.bf16.vlgmr.msra.gmra.mrb[4].mxu1 %vm1659_vm14, %v3879_v1  ;;  %v2280_v29 = vsel %vm1216_vm8, %v2276_v4, %v2278_v26  ;;  %v2279_v33 = vsel %vm1216_vm8, %v2274_v22, %v2276_v4  ;;  %v2291_v36 = vsel %vm1663_vm13, %v2278_v26, 0 }
 0x2f4   : > { %4086 = vmatpush3.bf16.msra.mxu1 %v1973_v9  ;;  %3881 = vmatmul.mubr.msk.bf16.vlgmr.msra.gmra.mrb[4].mxu0 %vm1659_vm14, %v3879_v1  ;;  %v2285_v37 = vsel %vm1663_vm13, %v2279_v33, 0  ;;  %v3728_v33 = vld [vmem:[%s5300_s12] sm:$0xff] }
 0x2f5   : > { %1976 = vmatpush1.bf16.msra.mxu0 %v1967_v10  ;;  %4087 = vmatprep.mubr.msk.bf16.mxu1 %vm4511_vm0, %v4510_v3 }
 0x2f6   : > { %3888 = vmatprep.subr.msk.bf16.mxu0 %vm1663_vm13, %v2068_v12  ;;  %4091 = vmatprep.subr.bf16.mxu1 %v4510_v3  ;;  %v2380_v30 = vpop.permute.xlu1 %2379  ;;  %v2382_v34 = vpop.permute.xlu0 %2381 }
 0x2f7   : > { %2007 = vmatprep.mubr.bf16.mxu0 %v4512_v6  ;;  %v2385_v41 = vsel %vm1341_vm9, %v2380_v30, %v2382_v34 }
 0x2f8   : > { %v2391_v45 = vsel %vm1663_vm13, %v2385_v41, 0 }
 0x2fa   : > { %v2384_v35 = vpop.permute.xlu1 %2383  ;;  %v2486_v39 = vpop.permute.xlu0 %2485 }
 0x2fb   : > { %v2386_v38 = vsel %vm1341_vm9, %v2382_v34, %v2384_v35  ;;  %v2397_v44 = vsel %vm1663_vm13, %v2384_v35, 0  ;;  %v3599_v34 = vld [vmem:[%s5298_s10] sm:$0xff] }
 0x2fe   : > { %v2488_v42 = vpop.permute.xlu1 %2487  ;;  %v2490_v43 = vpop.permute.xlu0 %2489 }
 0x2ff   : > { %4088 = vmatmul.mubr.msk.bf16.vlgmr.msra.gmra.mrb[4].mxu1 %vm1659_vm14, %v3883_v14  ;;  %v2492_v46 = vsel %vm5323_vm10, %v2488_v42, %v2490_v43  ;;  %v2491_v48 = vsel %vm5323_vm10, %v2486_v39, %v2488_v42  ;;  %v2503_v49 = vsel %vm1663_vm13, %v2490_v43, 0  ;;  %v3909_v43 = vld [vmem:[%s5296_s8 + $0x4] sm:$0xf] }
 0x300   : > { %4092 = vmatpush3.bf16.msra.mxu1 %v2079_v18  ;;  %3885 = vmatmul.mubr.msk.bf16.vlgmr.msra.gmra.mrb[4].mxu0 %vm1659_vm14, %v3883_v14  ;;  %v2497_v50 = vsel %vm1663_vm13, %v2491_v48, 0 }
 0x301   : > { %2082 = vmatpush1.bf16.msra.mxu0 %v2073_v19  ;;  %4093 = vmatprep.mubr.msk.bf16.mxu1 %vm4511_vm0, %v4510_v3 }
 0x302   : > { %3892 = vmatprep.subr.msk.bf16.mxu0 %vm1663_vm13, %v2174_v21  ;;  %4097 = vmatprep.subr.bf16.mxu1 %v4510_v3 }
 0x303   : > { %2113 = vmatprep.mubr.bf16.mxu0 %v4512_v6 }
 0x30b   : > { %4094 = vmatmul.mubr.msk.bf16.vlgmr.msra.gmra.mrb[4].mxu1 %vm1659_vm14, %v3887_v24 }
 0x30c   : > { %4098 = vmatpush3.bf16.msra.mxu1 %v2185_v27  ;;  %3889 = vmatmul.mubr.msk.bf16.vlgmr.msra.gmra.mrb[4].mxu0 %vm1659_vm14, %v3887_v24  ;;  %v3618_v27 = vrot.slane %v3608_v31, %v4660_v7 }
 0x30d   : > { %2188 = vmatpush1.bf16.msra.mxu0 %v2179_v28  ;;  %4099 = vmatprep.mubr.msk.bf16.mxu1 %vm4511_vm0, %v4510_v3 }
 0x30e   : > { %3896 = vmatprep.subr.msk.bf16.mxu0 %vm1663_vm13, %v2280_v29  ;;  %4103 = vmatprep.subr.bf16.mxu1 %v4510_v3  ;;  %v3626_v28 = vcombine.high %v3618_v27, %v3618_v27  ;;  %v3611_v29 = vcombine.high %v3608_v31, %v3608_v31 }
 0x30f   : > { %2219 = vmatprep.mubr.bf16.mxu0 %v4512_v6  ;;  %v2593_v52 = vpop.permute.xlu1 %2592  ;;  %v2602_v53 = vpop.permute.xlu0 %2601 }
 0x310   : > { %v3625_v30 = vrot.slane %v3611_v29, %v4660_v7  ;;  %v3740_v7 = vld [vmem:[%s5301_s13] sm:$0xff] }
 0x317   : > { %4100 = vmatmul.mubr.msk.bf16.vlgmr.msra.gmra.mrb[4].mxu1 %vm1659_vm14, %v3891_v32 }
 0x318   : > { %4104 = vmatpush3.bf16.msra.mxu1 %v2291_v36  ;;  %3893 = vmatmul.mubr.msk.bf16.vlgmr.msra.gmra.mrb[4].mxu0 %vm1659_vm14, %v3891_v32  ;;  %v3590_v32 = vld [vmem:[%s5297_s9] sm:$0xff] }
 0x319   : > { %2294 = vmatpush1.bf16.msra.mxu0 %v2285_v37  ;;  %4105 = vmatprep.mubr.msk.bf16.mxu1 %vm4511_vm0, %v4510_v3 }
 0x31a   : > { %3900 = vmatprep.subr.msk.bf16.mxu0 %vm1663_vm13, %v2386_v38  ;;  %4109 = vmatprep.subr.bf16.mxu1 %v4510_v3 }
 0x31b   : > { %2325 = vmatprep.mubr.bf16.mxu0 %v4512_v6 }
 0x323   : > { %4106 = vmatmul.mubr.msk.bf16.vlgmr.msra.gmra.mrb[4].mxu1 %vm1659_vm14, %v3895_v40 }
 0x324   : > { %4110 = vmatpush3.bf16.msra.mxu1 %v2397_v44  ;;  %3897 = vmatmul.mubr.msk.bf16.vlgmr.msra.gmra.mrb[4].mxu0 %vm1659_vm14, %v3895_v40 }
 0x325   : > { %2400 = vmatpush1.bf16.msra.mxu0 %v2391_v45  ;;  %4111 = vmatprep.mubr.msk.bf16.mxu1 %vm4511_vm0, %v4510_v3 }
 0x326   : > { %3904 = vmatprep.subr.msk.bf16.mxu0 %vm1663_vm13, %v2492_v46  ;;  %4115 = vmatprep.subr.bf16.mxu1 %v4510_v3 }
 0x327   : > { %2431 = vmatprep.mubr.bf16.mxu0 %v4512_v6 }
 0x32f   : > { %4112 = vmatmul.mubr.msk.bf16.vlgmr.msra.gmra.mrb[4].mxu1 %vm1659_vm14, %v3899_v47 }
 0x330   : > { %4116 = vmatpush3.bf16.msra.mxu1 %v2503_v49  ;;  %3901 = vmatmul.mubr.msk.bf16.vlgmr.msra.gmra.mrb[4].mxu0 %vm1659_vm14, %v3899_v47 }
 0x331   : > { %2506 = vmatpush1.bf16.msra.mxu0 %v2497_v50  ;;  %4117 = vmatprep.mubr.msk.bf16.mxu1 %vm4511_vm0, %v4510_v3  ;;  %v2641_v50 = vld [vmem:[%s5296_s8] sm:$0xf] }
 0x332   : > { %2537 = vmatprep.mubr.bf16.mxu0 %v4512_v6  ;;  %4121 = vmatprep.subr.bf16.mxu1 %v4510_v3 }
 0x33b   : > { %4118 = vmatmul.mubr.msk.bf16.vlgmr.msra.gmra.mrb[4].mxu1 %vm1659_vm14, %v3903_v51 }
 0x33c   : > { %3905 = vmatmul.mubr.msk.bf16.vlgmr.msra.gmra.mrb[4].mxu0 %vm1659_vm14, %v3903_v51  ;;  %4123 = vmatprep.mubr.msk.bf16.mxu1 %vm4511_vm0, %v4510_v3 }
 0x33d   : > { %2706 = vmatprep.mubr.bf16.mxu0 %v4512_v6 }
 0x40e   : > { %v2580_v54 = vpop.f32.mrb[4].mxu1 }
 0x40f   : > { %v2597_v55 = vmul.f32 %v2593_v52, %v2580_v54  ;;  %v2539_v56 = vpop.f32.mrb[4].mxu0  ;;  %v4119_v57 = vpop.f32.mrb[5].mxu1 }
 0x410   : > { %v2595_v58 = vmul.f32 %v2593_v52, %v2539_v56  ;;  %v2541_v59 = vpop.f32.mrb[5].mxu0  ;;  %v2583_v60 = vpop.f32.mrb[6].mxu1 }
 0x411   : > { %v2606_v61 = vadd.f32 %v2602_v53, %v2597_v55  ;;  %v2596_v62 = vmul.f32 %v2593_v52, %v2541_v59  ;;  %v2543_v63 = vpop.f32.mrb[6].mxu0  ;;  %v4120_v0 = vpop.f32.mrb[7].mxu1 }
 0x412   : > { %v2604_v1 = vadd.f32 %v2602_v53, %v2595_v58  ;;  %v2544_v2 = vpop.f32.mrb[7].mxu0  ;;  %v3919_v58 = vld [vmem:[%s5296_s8 + $0x8] sm:$0xf] }
 0x413   : > { %vm2609_vm15 = vcmp.gt.f32.partialorder %v2606_v61, 0.0  ;;  %v2612_v5 = vmul.f32 0.1, %v2606_v61  ;;  %v2605_v8 = vadd.f32 %v2602_v53, %v2596_v62  ;;  %v3923_v2 = vld [vmem:[%s5296_s8 + $0xc] sm:$0xf] }
 0x414   : > { %vm2607_vm1 = vcmp.gt.f32.partialorder %v2604_v1, 0.0  ;;  %v2610_v9 = vmul.f32 0.1, %v2604_v1 }
 0x415   : > { %vm2608_vm10 = vcmp.gt.f32.partialorder %v2605_v8, 0.0  ;;  %v2611_v10 = vmul.f32 0.1, %v2605_v8  ;;  %v2615_v12 = vsel %vm2609_vm15, %v2606_v61, %v2612_v5 }
 0x416   : > { %v2618_v13 = vmul.f32 %v2615_v12, %v4865_v11  ;;  %v2613_v14 = vsel %vm2607_vm1, %v2604_v1, %v2610_v9  ;;  %vm5348_vm1 = vcmask 736256  }
 0x417   : > { %v2614_v15 = vsel %vm2608_vm10, %v2605_v8, %v2611_v10  ;;  %v2616_v16 = vmul.f32 %v2613_v14, %v4868_v20 }
 0x418   : > { %v3956_v17 = vpack.c.bf16 %v2618_v13, %v2618_v13  ;;  %v2617_v18 = vmul.f32 %v2614_v15, %v4871_v23  ;;  %v3927_v15 = vld [vmem:[%s5296_s8 + $0x10] sm:$0xf] }
 0x41a   : > { %2632 = vrot.lane.b32.xlu0 %v3956_v17, %s5347_s4  ;;  %v3955_v19 = vpack.c.bf16 %v2617_v18, %v2616_v16 }
 0x41c   : > { %2630 = vrot.lane.b32.xlu1 %v3955_v19, %s5347_s4  ;;  %s4449_s4 = sshll.u32 %s4522_s3, 4  ;;  %s4450_s4 = int_to_ptr.vmem [resolvable:$false] %s4449_s4 }
 0x41d   : > { %s4451_s18 = scalar_lea.vmem %s4450_s4, 768 }
 0x48c   : > { %v2633_v24 = vpop.permute.xlu0 %2632 }
 0x48e   : > { %v2631_v21 = vpop.permute.xlu1 %2630 }
 0x48f   : > { %v2634_v22 = vrot.slane %v2631_v21, 4 }
 0x491   : > { %v2635_v25 = vsel %vm1627_vm11, %v2634_v22, %v2631_v21  ;;  %v2636_v4 = vsel %vm1627_vm11, %v2634_v22, %v2633_v24 }
 0x492   : > { %2639 = vst.msk [vmem:[#allocation3] sm:$0xff] %vm4877_vm3, %v2635_v25  ;;  %v3931_v25 = vld [vmem:[%s5296_s8 + $0x14] sm:$0xf]  ;;  %vm5350_vm3 = vcmask 1041408  }
 0x493   : > { %2640 = vst.msk [vmem:[#allocation3 + $0x8] sm:$0xf] %vm1636_vm12, %v2636_v4 }
 0x499   : > { %v2642_v11 = vld [vmem:[#allocation3] sm:$0xff] }
 0x49a   : > { %v5050_v20 = vcombine.low %v2642_v11, %v2642_v11  ;;  %v3911_v23 = vcombine.high %v2642_v11, %v2642_v11  ;;  %v4443_v26 = vld [vmem:[#allocation3 + $0x8] ss:$0 sps:$4 sm:$0xff]  }
 0x49b   : > { %v2765_v46 = vsel %vm1663_vm13, %v4443_v26, 0 }
 0x49c   : > { %2654 = vrot.lane.b32.xlu1 %v5050_v20, %s5339_s21  ;;  %2656 = vrot.lane.b32.xlu0 %v3911_v23, %s5339_s21  ;;  %v2759_v47 = vsel %vm1663_vm13, %v5050_v20, 0 }
 0x4a0   : > { %2850 = vrot.lane.b32.xlu0 %v5050_v20, %s5340_s25  ;;  %2658 = vrot.lane.b32.xlu1 %v4443_v26, %s5339_s21 }
 0x4a4   : > { %2854 = vrot.lane.b32.xlu0 %v4443_v26, %s5340_s25  ;;  %2852 = vrot.lane.b32.xlu1 %v3911_v23, %s5340_s25 }
 0x4a8   : > { %2958 = vrot.lane.b32.xlu0 %v3911_v23, %s5341_s26  ;;  %2956 = vrot.lane.b32.xlu1 %v5050_v20, %s5341_s26 }
 0x4ac   : > { %3062 = vrot.lane.b32.xlu0 %v5050_v20, %s5342_s27  ;;  %2960 = vrot.lane.b32.xlu1 %v4443_v26, %s5341_s26 }
 0x4b0   : > { %3066 = vrot.lane.b32.xlu0 %v4443_v26, %s5342_s27  ;;  %3064 = vrot.lane.b32.xlu1 %v3911_v23, %s5342_s27 }
 0x4b4   : > { %3170 = vrot.lane.b32.xlu0 %v3911_v23, %s5343_s28  ;;  %3168 = vrot.lane.b32.xlu1 %v5050_v20, %s5343_s28 }
 0x4b8   : > { %3274 = vrot.lane.b32.xlu0 %v5050_v20, %s5344_s20  ;;  %3172 = vrot.lane.b32.xlu1 %v4443_v26, %s5343_s28 }
 0x4bc   : > { %3278 = vrot.lane.b32.xlu0 %v4443_v26, %s5344_s20  ;;  %3276 = vrot.lane.b32.xlu1 %v3911_v23, %s5344_s20 }
 0x4c0   : > { %3382 = vrot.lane.b32.xlu0 %v3911_v23, %s5345_s0  ;;  %3380 = vrot.lane.b32.xlu1 %v5050_v20, %s5345_s0 }
 0x4c4   : > { %3486 = vrot.lane.b32.xlu0 %v5050_v20, %s5346_s1  ;;  %3384 = vrot.lane.b32.xlu1 %v4443_v26, %s5345_s0  ;;  %s458_s0 = sand.u32 1, %s4499_s30  }
 0x4c5   : > { %s4373_s21 = smul.u32 24, %s458_s0 }
 0x4c7   : > { %s460_s25 = scalar_lea.vmem [#allocation4], %s4373_s21 }
 0x4c8   : > { %3490 = vrot.lane.b32.xlu0 %v4443_v26, %s5346_s1  ;;  %3488 = vrot.lane.b32.xlu1 %v3911_v23, %s5346_s1  ;;  %s4375_s1 = smul.u32 384, %s4619_s17  ;;  %s3768_s26 = sshll.u32 %s460_s25, 4  ;;  %s5246_s26 = int_to_ptr.vmem [resolvable:$true] %s3768_s26 }
 0x4c9   : > { %s3754_s17 = scalar_lea.sflag [#allocation5], %s458_s0  ;;  %s4445_s2 = scalar_lea.vmem %s5246_s26, 384 }
 0x4ca   : > { %s5244_s22 = scalar_lea.hbm %s5302_s14, %s4375_s1  ;;  %p4446_p11 = scmp.ne.s32.totalorder %s5246_s26, %s4445_s2 }
 0x4cb   : > { %p4452_p0 = scmp.lt.s32.totalorder %s5246_s26, %s4450_s4  ;;  %p4453_p1 = scmp.lt.s32.totalorder %s4451_s18, %s4445_s2 }
 0x4cc   : > { %3629 = vrot.lane.b32.xlu0 %v3626_v28, %s5342_s27  ;;  %3627 = vrot.lane.b32.xlu1 %v3618_v27, %s5342_s27  ;;  %v3935_v28 = vld [vmem:[%s5296_s8 + $0x18] sm:$0xf]  ;;  %p4447_p12 = pnand %p4446_p11, %p4636_p5 }
 0x4cd   : > { %p4454_p2 = por %p4453_p1, %p4452_p0 }
 0x4ce   : > { %p4448_p13 = pneg %p4447_p12 }
 0x4d0   : > { %3593 = vperm.xlu0 %4428, %v3590_v32   ;;  %3631 = vrot.lane.b32.xlu1 %v3625_v30, %s5342_s27  ;;  %p4455_p3 = pnand %p4454_p2, %p4448_p13 }
 0x4d4   : > { %3731 = vperm.xlu0 %4428, %v3728_v33   ;;  %3602 = vperm.xlu1 %4429, %v3599_v34  }
 0x4d8   : > { %3743 = vperm.xlu1 %4429, %v3740_v7  }
 0x50e   : > { %v2655_v35 = vpop.permute.xlu1 %2654  ;;  %v2657_v36 = vpop.permute.xlu0 %2656 }
 0x50f   : > { %v2660_v37 = vsel %vm499_vm2, %v2655_v35, %v2657_v36 }
 0x510   : > { %v2666_v42 = vsel %vm1663_vm13, %v2660_v37, 0 }
 0x512   : > { %v2659_v38 = vpop.permute.xlu1 %2658  ;;  %v2851_v39 = vpop.permute.xlu0 %2850 }
 0x513   : > { %v2661_v40 = vsel %vm499_vm2, %v2657_v36, %v2659_v38  ;;  %v2672_v41 = vsel %vm1663_vm13, %v2659_v38, 0  ;;  %v3939_v36 = vld [vmem:[%s5296_s8 + $0x1c] sm:$0xf]  ;;  %vm5349_vm2 = vmmov %vm5348_vm1 }
 0x514   : > { %3913 = vmatprep.subr.msk.bf16.mxu0 %vm1663_vm13, %v2661_v40  ;;  %4122 = vmatpush3.bf16.msra.mxu1 %v2672_v41 }
 0x515   : > { %2675 = vmatpush1.bf16.msra.mxu0 %v2666_v42  ;;  %4127 = vmatprep.subr.bf16.mxu1 %v4510_v3 }
 0x516   : > { %v2853_v44 = vpop.permute.xlu1 %2852  ;;  %3916 = vmatprep.subr.msk.bf16.mxu0 %vm1663_vm13, %v3911_v23  ;;  %v2855_v45 = vpop.permute.xlu0 %2854 }
 0x517   : > { %4124 = vmatmul.mubr.msk.bf16.vlgmr.msra.gmra.mrb[8].mxu1 %vm1659_vm14, %v3909_v43  ;;  %v2857_v48 = vsel %vm716_vm4, %v2853_v44, %v2855_v45  ;;  %v2856_v51 = vsel %vm716_vm4, %v2851_v39, %v2853_v44  ;;  %v2868_v54 = vsel %vm1663_vm13, %v2855_v45, 0  ;;  %v3943_v44 = vld [vmem:[%s5296_s8 + $0x20] sm:$0xf]  ;;  %vm5351_vm4 = vmmov %vm5350_vm3 }
 0x518   : > { %3914 = vmatmul.mubr.msk.bf16.vlgmr.msra.gmra.mrb[8].mxu0 %vm1659_vm14, %v3909_v43  ;;  %4128 = vmatpush3.bf16.msra.mxu1 %v2765_v46  ;;  %v2862_v55 = vsel %vm1663_vm13, %v2856_v51, 0 }
 0x519   : > { %2768 = vmatpush1.bf16.msra.mxu0 %v2759_v47  ;;  %4129 = vmatprep.mubr.msk.bf16.mxu1 %vm4511_vm0, %v4510_v3  ;;  %v3609_v47 = vld [vmem:[%s5299_s11] sm:$0xf] }
 0x51a   : > { %3920 = vmatprep.subr.msk.bf16.mxu0 %vm1663_vm13, %v2857_v48  ;;  %4133 = vmatprep.subr.bf16.mxu1 %v4510_v3  ;;  %v2957_v49 = vpop.permute.xlu1 %2956  ;;  %v2959_v52 = vpop.permute.xlu0 %2958 }
 0x51b   : > { %2799 = vmatprep.mubr.bf16.mxu0 %v4512_v6  ;;  %v2962_v59 = vsel %vm841_vm5, %v2957_v49, %v2959_v52 }
 0x51c   : > { %v2968_v63 = vsel %vm1663_vm13, %v2962_v59, 0 }
 0x51e   : > { %v2961_v53 = vpop.permute.xlu1 %2960  ;;  %v3063_v57 = vpop.permute.xlu0 %3062 }
 0x51f   : > { %v2963_v56 = vsel %vm841_vm5, %v2959_v52, %v2961_v53  ;;  %v2974_v62 = vsel %vm1663_vm13, %v2961_v53, 0  ;;  %vm5352_vm5 = vmmov %vm5350_vm3 }
 0x522   : > { %v3065_v60 = vpop.permute.xlu1 %3064  ;;  %v3067_v61 = vpop.permute.xlu0 %3066 }
 0x523   : > { %4130 = vmatmul.mubr.msk.bf16.vlgmr.msra.gmra.mrb[8].mxu1 %vm1659_vm14, %v2641_v50  ;;  %v3069_v0 = vsel %vm966_vm6, %v3065_v60, %v3067_v61  ;;  %v3068_v5 = vsel %vm966_vm6, %v3063_v57, %v3065_v60  ;;  %v3080_v10 = vsel %vm1663_vm13, %v3067_v61, 0 }
 0x524   : > { %4134 = vmatpush3.bf16.msra.mxu1 %v2868_v54  ;;  %3917 = vmatmul.mubr.msk.bf16.vlgmr.msra.gmra.mrb[8].mxu0 %vm1659_vm14, %v2641_v50  ;;  %v3074_v12 = vsel %vm1663_vm13, %v3068_v5, 0 }
 0x525   : > { %2871 = vmatpush1.bf16.msra.mxu0 %v2862_v55  ;;  %4135 = vmatprep.mubr.msk.bf16.mxu1 %vm4511_vm0, %v4510_v3 }
 0x526   : > { %3924 = vmatprep.subr.msk.bf16.mxu0 %vm1663_vm13, %v2963_v56  ;;  %4139 = vmatprep.subr.bf16.mxu1 %v4510_v3  ;;  %v3169_v1 = vpop.permute.xlu1 %3168  ;;  %v3171_v8 = vpop.permute.xlu0 %3170 }
 0x527   : > { %2902 = vmatprep.mubr.bf16.mxu0 %v4512_v6  ;;  %v3174_v16 = vsel %vm1091_vm7, %v3169_v1, %v3171_v8 }
 0x528   : > { %v3180_v21 = vsel %vm1663_vm13, %v3174_v16, 0 }
 0x52a   : > { %v3173_v9 = vpop.permute.xlu1 %3172  ;;  %v3275_v14 = vpop.permute.xlu0 %3274 }
 0x52b   : > { %v3175_v13 = vsel %vm1091_vm7, %v3171_v8, %v3173_v9  ;;  %v3186_v19 = vsel %vm1663_vm13, %v3173_v9, 0 }
 0x52e   : > { %v3277_v17 = vpop.permute.xlu1 %3276  ;;  %v3279_v18 = vpop.permute.xlu0 %3278 }
 0x52f   : > { %4136 = vmatmul.mubr.msk.bf16.vlgmr.msra.gmra.mrb[8].mxu1 %vm1659_vm14, %v3919_v58  ;;  %v3281_v22 = vsel %vm1216_vm8, %v3277_v17, %v3279_v18  ;;  %v3280_v4 = vsel %vm1216_vm8, %v3275_v14, %v3277_v17  ;;  %v3292_v23 = vsel %vm1663_vm13, %v3279_v18, 0 }
 0x530   : > { %4140 = vmatpush3.bf16.msra.mxu1 %v2974_v62  ;;  %3921 = vmatmul.mubr.msk.bf16.vlgmr.msra.gmra.mrb[8].mxu0 %vm1659_vm14, %v3919_v58  ;;  %v3286_v26 = vsel %vm1663_vm13, %v3280_v4, 0 }
 0x531   : > { %2977 = vmatpush1.bf16.msra.mxu0 %v2968_v63  ;;  %4141 = vmatprep.mubr.msk.bf16.mxu1 %vm4511_vm0, %v4510_v3 }
 0x532   : > { %3928 = vmatprep.subr.msk.bf16.mxu0 %vm1663_vm13, %v3069_v0  ;;  %4145 = vmatprep.subr.bf16.mxu1 %v4510_v3  ;;  %v3381_v24 = vpop.permute.xlu1 %3380  ;;  %v3383_v11 = vpop.permute.xlu0 %3382 }
 0x533   : > { %3008 = vmatprep.mubr.bf16.mxu0 %v4512_v6  ;;  %v3386_v29 = vsel %vm1341_vm9, %v3381_v24, %v3383_v11 }
 0x534   : > { %v3392_v34 = vsel %vm1663_vm13, %v3386_v29, 0 }
 0x536   : > { %v3385_v20 = vpop.permute.xlu1 %3384  ;;  %v3487_v27 = vpop.permute.xlu0 %3486 }
 0x537   : > { %v3387_v31 = vsel %vm1341_vm9, %v3383_v11, %v3385_v20  ;;  %v3398_v33 = vsel %vm1663_vm13, %v3385_v20, 0 }
 0x53a   : > { %v3489_v30 = vpop.permute.xlu1 %3488  ;;  %v3491_v32 = vpop.permute.xlu0 %3490 }
 0x53b   : > { %4142 = vmatmul.mubr.msk.bf16.vlgmr.msra.gmra.mrb[8].mxu1 %vm1659_vm14, %v3923_v2  ;;  %v3493_v7 = vsel %vm5348_vm1, %v3489_v30, %v3491_v32  ;;  %v3492_v37 = vsel %vm5349_vm2, %v3487_v27, %v3489_v30  ;;  %v3504_v40 = vsel %vm1663_vm13, %v3491_v32, 0 }
 0x53c   : > { %4146 = vmatpush3.bf16.msra.mxu1 %v3080_v10  ;;  %3925 = vmatmul.mubr.msk.bf16.vlgmr.msra.gmra.mrb[8].mxu0 %vm1659_vm14, %v3923_v2  ;;  %v3498_v42 = vsel %vm1663_vm13, %v3492_v37, 0 }
 0x53d   : > { %3083 = vmatpush1.bf16.msra.mxu0 %v3074_v12  ;;  %4147 = vmatprep.mubr.msk.bf16.mxu1 %vm4511_vm0, %v4510_v3 }
 0x53e   : > { %3932 = vmatprep.subr.msk.bf16.mxu0 %vm1663_vm13, %v3175_v13  ;;  %4151 = vmatprep.subr.bf16.mxu1 %v4510_v3  ;;  %v3628_v35 = vpop.permute.xlu1 %3627  ;;  %v3630_v38 = vpop.permute.xlu0 %3629 }
 0x53f   : > { %3114 = vmatprep.mubr.bf16.mxu0 %v4512_v6  ;;  %v3633_v43 = vsel %vm966_vm6, %v3628_v35, %v3630_v38 }
 0x540   : > { %v3639_v46 = vsel %vm5352_vm5, %v3633_v43, 0 }
 0x542   : > { %v3632_v39 = vpop.permute.xlu1 %3631 }
 0x543   : > { %v3634_v41 = vsel %vm966_vm6, %v3630_v38, %v3632_v39  ;;  %v3645_v45 = vsel %vm5351_vm4, %v3632_v39, 0  ;;  %vm5353_vm6 = vcmask 31744  }
 0x544   : > { %vm5354_vm7 = vmmov %vm5353_vm6 }
 0x547   : > { %4148 = vmatmul.mubr.msk.bf16.vlgmr.msra.gmra.mrb[8].mxu1 %vm1659_vm14, %v3927_v15 }
 0x548   : > { %4152 = vmatpush3.bf16.msra.mxu1 %v3186_v19  ;;  %3929 = vmatmul.mubr.msk.bf16.vlgmr.msra.gmra.mrb[8].mxu0 %vm1659_vm14, %v3927_v15 }
 0x549   : > { %3189 = vmatpush1.bf16.msra.mxu0 %v3180_v21  ;;  %4153 = vmatprep.mubr.msk.bf16.mxu1 %vm4511_vm0, %v4510_v3 }
 0x54a   : > { %3936 = vmatprep.subr.msk.bf16.mxu0 %vm1663_vm13, %v3281_v22  ;;  %4157 = vmatprep.subr.bf16.mxu1 %v4510_v3 }
 0x54b   : > { %3220 = vmatprep.mubr.bf16.mxu0 %v4512_v6 }
 0x54f   : > { %v3594_v48 = vpop.permute.xlu0 %3593 }
 0x553   : > { %4154 = vmatmul.mubr.msk.bf16.vlgmr.msra.gmra.mrb[8].mxu1 %vm1659_vm14, %v3931_v25  ;;  %v3732_v59 = vpop.permute.xlu0 %3731 }
 0x554   : > { %4158 = vmatpush3.bf16.msra.mxu1 %v3292_v23  ;;  %3933 = vmatmul.mubr.msk.bf16.vlgmr.msra.gmra.mrb[8].mxu0 %vm1659_vm14, %v3931_v25 }
 0x555   : > { %3295 = vmatpush1.bf16.msra.mxu0 %v3286_v26  ;;  %4159 = vmatprep.mubr.msk.bf16.mxu1 %vm4511_vm0, %v4510_v3 }
 0x556   : > { %3940 = vmatprep.subr.msk.bf16.mxu0 %vm1663_vm13, %v3387_v31  ;;  %4163 = vmatprep.subr.bf16.mxu1 %v4510_v3 }
 0x557   : > { %3326 = vmatprep.mubr.bf16.mxu0 %v4512_v6 }
 0x55f   : > { %4160 = vmatmul.mubr.msk.bf16.vlgmr.msra.gmra.mrb[8].mxu1 %vm1659_vm14, %v3935_v28 }
 0x560   : > { %4164 = vmatpush3.bf16.msra.mxu1 %v3398_v33  ;;  %3937 = vmatmul.mubr.msk.bf16.vlgmr.msra.gmra.mrb[8].mxu0 %vm1659_vm14, %v3935_v28 }
 0x561   : > { %3401 = vmatpush1.bf16.msra.mxu0 %v3392_v34  ;;  %4165 = vmatprep.mubr.msk.bf16.mxu1 %vm4511_vm0, %v4510_v3 }
 0x562   : > { %3944 = vmatprep.subr.msk.bf16.mxu0 %vm1663_vm13, %v3493_v7  ;;  %4169 = vmatprep.subr.bf16.mxu1 %v4510_v3 }
 0x563   : > { %3432 = vmatprep.mubr.bf16.mxu0 %v4512_v6 }
 0x56b   : > { %4166 = vmatmul.mubr.msk.bf16.vlgmr.msra.gmra.mrb[8].mxu1 %vm1659_vm14, %v3939_v36 }
 0x56c   : > { %4170 = vmatpush3.bf16.msra.mxu1 %v3504_v40  ;;  %3941 = vmatmul.mubr.msk.bf16.vlgmr.msra.gmra.mrb[8].mxu0 %vm1659_vm14, %v3939_v36 }
 0x56d   : > { %3507 = vmatpush1.bf16.msra.mxu0 %v3498_v42  ;;  %4171 = vmatprep.mubr.msk.bf16.mxu1 %vm4511_vm0, %v4510_v3 }
 0x56e   : > { %3538 = vmatprep.mubr.bf16.mxu0 %v4512_v6  ;;  %3947 = vmatprep.subr.msk.bf16.mxu0 %vm5350_vm3, %v3634_v41 }
 0x56f   : > { %4175 = vmatprep.subr.bf16.mxu1 %v4510_v3 }
 0x577   : > { %4172 = vmatmul.mubr.msk.bf16.vlgmr.msra.gmra.mrb[8].mxu1 %vm1659_vm14, %v3943_v44 }
 0x578   : > { %3945 = vmatmul.mubr.msk.bf16.vlgmr.msra.gmra.mrb[8].mxu0 %vm1659_vm14, %v3943_v44  ;;  %4176 = vmatpush3.bf16.msra.mxu1 %v3645_v45 }
 0x579   : > { %3648 = vmatpush1.bf16.msra.mxu0 %v3639_v46  ;;  %4177 = vmatprep.mubr.msk.bf16.mxu1 %vm4511_vm0, %v4510_v3  ;;  %vm3751_vm0 = vcmask 261120  }
 0x57a   : > { %3679 = vmatprep.mubr.bf16.mxu0 %v4512_v6  ;;  %v3603_v6 = vpop.permute.xlu1 %3602 }
 0x57e   : > { %v3744_v15 = vpop.permute.xlu1 %3743 }
 0x57f   : > { %4178 = vmatmul.mubr.msk.bf16.vlgmr.msra.gmra.mrb[12].mxu1 %vm5353_vm6, %v3609_v47 }
 0x580   : > { %3948 = vmatmul.mubr.msk.bf16.vlgmr.msra.gmra.mrb[12].mxu0 %vm5354_vm7, %v3609_v47 }
 0x64a   : > { %v3581_v49 = vpop.f32.mrb[8].mxu1 }
 0x64b   : > { %v3540_v50 = vpop.f32.mrb[8].mxu0  ;;  %v4173_v51 = vpop.f32.mrb[9].mxu1  ;;  %v3598_v56 = vmul.f32 %v3594_v48, %v3581_v49 }
 0x64c   : > { %v3542_v52 = vpop.f32.mrb[9].mxu0  ;;  %v3584_v53 = vpop.f32.mrb[10].mxu1  ;;  %v3596_v57 = vmul.f32 %v3594_v48, %v3540_v50 }
 0x64d   : > { %v3544_v54 = vpop.f32.mrb[10].mxu0  ;;  %v4174_v3 = vpop.f32.mrb[11].mxu1  ;;  %v3597_v58 = vmul.f32 %v3594_v48, %v3542_v52  ;;  %v3607_v61 = vadd.f32 %v3603_v6, %v3598_v56 }
 0x64e   : > { %v3545_v55 = vpop.f32.mrb[11].mxu0  ;;  %v3605_v1 = vadd.f32 %v3603_v6, %v3596_v57 }
 0x64f   : > { %v3606_v9 = vadd.f32 %v3603_v6, %v3597_v58 }
 0x652   : > { %v3722_v60 = vpop.f32.mrb[12].mxu1 }
 0x653   : > { %v3736_v62 = vmul.f32 %v3732_v59, %v3722_v60  ;;  %v3681_v63 = vpop.f32.mrb[12].mxu0  ;;  %v4179_v0 = vpop.f32.mrb[13].mxu1 }
 0x654   : > { %v3734_v2 = vmul.f32 %v3732_v59, %v3681_v63  ;;  %v3683_v5 = vpop.f32.mrb[13].mxu0  ;;  %v3725_v8 = vpop.f32.mrb[14].mxu1 }
 0x655   : > { %v3739_v10 = vadd.f32 %v3736_v62, %v3607_v61  ;;  %v3735_v12 = vmul.f32 %v3732_v59, %v3683_v5  ;;  %v3685_v13 = vpop.f32.mrb[14].mxu0  ;;  %v4180_v14 = vpop.f32.mrb[15].mxu1 }
 0x656   : > { %v3737_v16 = vadd.f32 %v3734_v2, %v3605_v1  ;;  %v3686_v17 = vpop.f32.mrb[15].mxu0 }
 0x657   : > { %v3748_v18 = vadd.f32 %v3744_v15, %v3739_v10  ;;  %v3738_v19 = vadd.f32 %v3735_v12, %v3606_v9 }
 0x658   : > { %v3746_v21 = vadd.f32 %v3744_v15, %v3737_v16 }
 0x659   : > { %v3747_v22 = vadd.f32 %v3744_v15, %v3738_v19  ;;  %3752 = vst.msk [vmem:[%s460_s25 + $0x10] sm:$0xff] %vm3751_vm0, %v3748_v18 }
 0x65a   : > { %3749 = vst [vmem:[%s460_s25] sm:$0xff] %v3746_v21 }
 0x65b   : > { %3750 = vst [vmem:[%s460_s25 + $0x8] sm:$0xff] %v3747_v22 }
 0x65c   : > { %4458 = shalt.err (!%p4455_p3)
}
 0x65d   : > { %s4459_s20 = scalar_lea.hbm %s5244_s22, 384  ;;  %s4463_s1 = scalar_lea.hbm %s5302_s14, 768 }
 0x65e   : > { %p4460_p4 = scmp.ne.s32.totalorder %s5244_s22, %s4459_s20  ;;  %p4464_p9 = scmp.lt.u32.totalorder %s5244_s22, %s5302_s14 }
 0x65f   : > { %p4465_p10 = scmp.lt.u32.totalorder %s4463_s1, %s4459_s20  ;;  %p4467_p12 = scmp.lt.u32.totalorder %s4459_s20, %s5244_s22 }
 0x660   : > { %p4461_p7 = pnand %p4460_p4, %p4636_p5 }
 0x661   : > { %p4466_p11 = por %p4465_p10, %p4464_p9 }
 0x662   : > { %p4462_p8 = pneg %p4461_p7 }
 0x663   : > { %p4468_p13 = por %p4467_p12, %p4466_p11 }
 0x665   : > { %p4469_p0 = pnand %p4468_p13, %p4462_p8 }
 0x667   : > { %4472 = shalt.err (!%p4469_p0)
}
 0x668   : > { %4376 = dma.vmem_to_hbm [thread:$0]  (%p4636_p5), %s5246_s26, 384, %s5244_s22, %s3754_s17  }
 0x669 PF: > { %p4382_p1 = scmp.ge.s32.totalorder %s4507_s16, 2  ;;  %s3780_s27 = sand.u32 1, %s4495_s29  }
 0x66a   : > { %s3781_s2 = scalar_lea.sflag [#allocation5], %s3780_s27 }
 0x66b   : > { %p4379_p2 = pnand %p4382_p1, %p4640_p6 }
 0x66d   : > { %4490 = dma.done.wait (!%p4379_p2), %s3781_s2, 384  }
 0x66e   : > { %4492 = vsyncadd (!%p4379_p2), %s3781_s2, 4294966912  ;;  %s5355_s3 = sld [smem:[#allocation7_spill]]  ;;  %p24_p3 = scmp.ge.s32.totalorder %s4623_s19, 4  }
 0x66f   : > { %s5356_s29 = smov %s4499_s30  ;;  %s5357_s30 = smov %s4503_s15 }
 0x670   : > { %s5359_s16 = smov %s4623_s19  ;;  %26 = sbr.rel (!%p24_p3) target bundleno = 9 (0x9), region = 135 }
 0x674   : > { %s5358_s15 = smov %s5355_s3 }
 0x677   :  { %3786 = vsyncpa [#allocation5], 1 }
 0x678   :  { %3788 = vsyncpa [#allocation5 + $0x1], 1 }

</bundles_post_ra>
